<compile_context>
chip_gen: v7x
topology: tpu7x:2x2x1
jax: 0.10.0
libtpu: 0.0.40
codegen_flags: <defaults>
</compile_context>

<pallas_src>
import jax
import jax.numpy as jnp
import numpy as np
from jax import lax
from jax.experimental import pallas as pl
from jax.experimental.pallas import tpu as pltpu

EPS = 1e-5          # nn.BatchNorm2d default eps
NEG_SLOPE = 0.01    # nn.LeakyReLU default negative_slope


# --------------------------------------------------------------------------------------
# Pallas kernel: one fully fused UpBlock level (+ deep-supervision head)
# --------------------------------------------------------------------------------------

def _upblock_kernel(xin_ref, sk_ref, wp_ref, ah_ref, bup_ref,
                    wa_ref, wb_ref, s1_ref, b1_ref,
                    w2_ref, s2_ref, b2_ref, wh_ref, bh_ref,
                    o_ref, oh_ref, pad):
    """Fused: conv1x1 -> bilinear 2x up -> cat(skip, up) -> ConvBlock -> DS head.

    xin_ref : (nb, h, w*C1)  bf16 lane-flat deep feature (h = H//2)
    sk_ref  : (nb, H+2, W*Ca) bf16 lane-flat skip feature, zero rows top/bottom
    wp_ref  : (w*C1, W*Cb)   bf16   1x1 projection fused with width-direction interp
    ah_ref  : (nb*H, nb*h)   f32    height-direction interp (block-diag over batch)
    bup_ref : (1, W*Cb)      f32    projection bias (lane-tiled)
    wa/wb   : (3, W*Ca, W*Cout) / (3, W*Cb, W*Cout) bf16 block-Toeplitz conv1 weights
    w2/wh   : (3, W*Cout, W*Cout) / (3, W*Cout, W*ncls) bf16 block-Toeplitz weights
    s1,b1,s2,b2,bh : (1, lanes) f32 folded eval-BN scale/bias and head bias
    o_ref   : (nb*H, W*Cout) bf16 lane-dense ConvBlock output
    oh_ref  : (nb*H, W*ncls) f32  lane-dense deep-supervision output
    pad     : (nb, H+2, W*Cout) bf16 VMEM scratch (upsampled / y1 / y2, reused)
    """
    nb, Hp, L = pad.shape
    H = Hp - 2
    M = nb * H
    h = xin_ref.shape[1]
    neg = jnp.float32(NEG_SLOPE)

    # zero the top/bottom halo rows once per step; the interior is always overwritten
    pad[:, 0:1, :] = jnp.zeros((nb, 1, L), pad.dtype)
    pad[:, Hp - 1:Hp, :] = jnp.zeros((nb, 1, L), pad.dtype)

    # --- 1x1 projection fused with the width-direction bilinear interp (lane map) ---
    xin = xin_ref[...].reshape(nb * h, xin_ref.shape[2])
    proj = jnp.dot(xin, wp_ref[...], preferred_element_type=jnp.float32)
    # --- height-direction bilinear interp (+ projection bias; interp rows sum to 1) ---
    up = jnp.dot(ah_ref[...], proj, preferred_element_type=jnp.float32) + bup_ref[...]
    pad[:, 1:Hp - 1, :] = up.reshape(nb, H, L).astype(pad.dtype)

    def conv3(src_ref, w_ref):
        # 3x3 'same' conv as 3 row-shifted lane-space (block-Toeplitz) matmuls.
        acc = None
        for ky in range(3):
            lhs = src_ref[:, ky:ky + H, :].reshape(M, src_ref.shape[2])
            r = jnp.dot(lhs, w_ref[ky], preferred_element_type=jnp.float32)
            acc = r if acc is None else acc + r
        return acc

    # conv1 over cat(skip, up) == conv(skip) + conv(up);  eval-BN affine + LeakyReLU
    y = conv3(sk_ref, wa_ref) + conv3(pad, wb_ref)
    y = y * s1_ref[...] + b1_ref[...]
    y = jnp.where(y > 0, y, neg * y)
    # TODO(synk): Dropout(p=0.0) is the identity.

    # conv2 + eval-BN affine + LeakyReLU (reuses the same padded scratch)
    pad[:, 1:Hp - 1, :] = y.reshape(nb, H, L).astype(pad.dtype)
    y = conv3(pad, w2_ref) * s2_ref[...] + b2_ref[...]
    y = jnp.where(y > 0, y, neg * y)
    yb = y.astype(o_ref.dtype)
    o_ref[...] = yb                                   # lane-dense 128-wide store

    # fused deep-supervision 3x3 head
    pad[:, 1:Hp - 1, :] = yb.reshape(nb, H, L)
    oh_ref[...] = conv3(pad, wh_ref) + bh_ref[...]


# --------------------------------------------------------------------------------------
# Pallas wrapper
# --------------------------------------------------------------------------------------

def upblock_pallas(xin, sk, p, H, W):
    """One fused UpBlock level (lane-flat in / lane-flat out)."""
    N, h, Lin = xin.shape
    Hp, Lsk = sk.shape[1], sk.shape[2]
    Lup = p['wp'].shape[1]
    Lout = p['s2'].shape[1]
    Wn = p['bh'].shape[1]
    assert Hp == H + 2 and H == 2 * h
    assert Lin == p['wp'].shape[0] and Lup == Lout

    # nb=1 -> grid over batch (2 steps on the big levels: uses both v7x cores and
    # enables DMA/compute overlap).  Fold the batch only when the per-sample row count
    # would violate the (8/16,128) block-shape rules on the tiny levels.
    nb = 1 if (H % 16 == 0) else N
    grid = (N // nb,)

    ah = jnp.asarray(np.kron(np.eye(nb, dtype=np.float32), bilinear_matrix(h, H)),
                     jnp.float32)

    M = N * H
    flops = int(2 * N * h * Lin * Lup + 2 * M * nb * h * Lup
                + 3 * 2 * M * (Lsk + Lup) * Lout
                + 3 * 2 * M * Lout * Lout + 3 * 2 * M * Lout * Wn)
    bytes_accessed = int(2 * (N * h * Lin + N * Hp * Lsk + M * Lout) + 4 * M * Wn
                         + 2 * (p['wp'].size + p['wa'].size + p['wb'].size
                                + p['w2'].size + p['wh'].size))

    o, oh = pl.pallas_call(
        _upblock_kernel,
        out_shape=(jax.ShapeDtypeStruct((N * H, Lout), jnp.bfloat16),
                   jax.ShapeDtypeStruct((N * H, Wn), jnp.float32)),
        grid_spec=pltpu.PrefetchScalarGridSpec(
            num_scalar_prefetch=0,
            grid=grid,
            in_specs=[
                pl.BlockSpec((nb, h, Lin), lambda i: (i, 0, 0)),
                pl.BlockSpec((nb, Hp, Lsk), lambda i: (i, 0, 0)),
                pl.BlockSpec(p['wp'].shape, lambda i: (0, 0)),
                pl.BlockSpec(ah.shape, lambda i: (0, 0)),
                pl.BlockSpec(p['bup'].shape, lambda i: (0, 0)),
                pl.BlockSpec(p['wa'].shape, lambda i: (0, 0, 0)),
                pl.BlockSpec(p['wb'].shape, lambda i: (0, 0, 0)),
                pl.BlockSpec(p['s1'].shape, lambda i: (0, 0)),
                pl.BlockSpec(p['b1'].shape, lambda i: (0, 0)),
                pl.BlockSpec(p['w2'].shape, lambda i: (0, 0, 0)),
                pl.BlockSpec(p['s2'].shape, lambda i: (0, 0)),
                pl.BlockSpec(p['b2'].shape, lambda i: (0, 0)),
                pl.BlockSpec(p['wh'].shape, lambda i: (0, 0, 0)),
                pl.BlockSpec(p['bh'].shape, lambda i: (0, 0)),
            ],
            out_specs=[
                pl.BlockSpec((nb * H, Lout), lambda i: (i, 0)),
                pl.BlockSpec((nb * H, Wn), lambda i: (i, 0)),
            ],
            scratch_shapes=[pltpu.VMEM((nb, Hp, Lout), jnp.bfloat16)],
        ),
        compiler_params=pltpu.CompilerParams(
            dimension_semantics=("parallel",),
            vmem_limit_bytes=32 * 1024 * 1024),
        cost_estimate=pl.CostEstimate(flops=flops, transcendentals=0,
                                      bytes_accessed=bytes_accessed),
    )(xin, sk, p['wp'], ah, p['bup'], p['wa'], p['wb'], p['s1'], p['b1'],
      p['w2'], p['s2'], p['b2'], p['wh'], p['bh'])

    ncls = Wn // W
    return o.reshape(N, H, Lout), oh.reshape(N, H, W, ncls)


# --------------------------------------------------------------------------------------
# Small XLA glue (memory-bound resamples) + full decoder forward
# --------------------------------------------------------------------------------------

def bilinear_matrix(n_in, n_out):
    """Interpolation matrix of nn.Upsample(mode='bilinear', align_corners=True)."""
    if n_in == 1:
        return np.ones((n_out, 1), np.float32)
    src = np.arange(n_out, dtype=np.float64) * (n_in - 1) / (n_out - 1)
    i0 = np.clip(np.floor(src).astype(np.int64), 0, n_in - 1)
    i1 = np.minimum(i0 + 1, n_in - 1)
    frac = src - i0
    a = np.zeros((n_out, n_in), np.float64)
    a[np.arange(n_out), i0] += 1.0 - frac
    a[np.arange(n_out), i1] += frac
    return a.astype(np.float32)


def nearest_resize_nhwc(x, out_hw):
    # torch.nn.functional.interpolate(..., size=shape) with default mode='nearest'.
    n, h, w, c = x.shape
    H, W = out_hw
    ri = (jnp.arange(H) * h) // H
    ci = (jnp.arange(W) * w) // W
    return x[:, ri][:, :, ci]


def decoder_ds_forward(features_nchw, shape, packed):
    """Pallas forward of Decoder_DS.forward(feature, shape); NCHW in, NCHW out."""
    feats = [jnp.transpose(f, (0, 2, 3, 1)) for f in features_nchw]   # NCHW -> NHWC once
    x0, x1, x2, x3, x4 = feats
    skips = [x3, x2, x1, x0]
    N = x4.shape[0]

    # deep feature in lane-flat bf16 layout: rows (n, h), lanes (w, c)
    _, h4, w4, c4 = x4.shape
    x = x4.reshape(N, h4, w4 * c4).astype(jnp.bfloat16)

    heads = []
    for lvl in range(4):
        skip = skips[lvl]
        _, H, W, Ca = skip.shape
        sk = jnp.pad(skip.reshape(N, H, W * Ca).astype(jnp.bfloat16),
                     ((0, 0), (1, 1), (0, 0)))
        x, head = upblock_pallas(x, sk, packed[lvl], H, W)
        heads.append(head)                       # (N, H, W, ncls) f32

    dp3, dp2, dp1, dp0 = heads
    dp1 = nearest_resize_nhwc(dp1, shape)
    dp2 = nearest_resize_nhwc(dp2, shape)
    dp3 = nearest_resize_nhwc(dp3, shape)
    to_nchw = lambda t: jnp.transpose(t, (0, 3, 1, 2))
    return to_nchw(dp0), to_nchw(dp1), to_nchw(dp2), to_nchw(dp3)


# --------------------------------------------------------------------------------------
# Deterministic parameter construction / packing (lane-space block-Toeplitz weights)
# --------------------------------------------------------------------------------------

def make_conv(key, cin, cout, k):
    kw, kb = jax.random.split(key)
    w = jax.random.normal(kw, (cout, cin, k, k), jnp.float32) / np.sqrt(cin * k * k)
    b = 0.1 * jax.random.normal(kb, (cout,), jnp.float32)
    return w, b


def make_bn(key, c):
    kg, kb, km, kv = jax.random.split(key, 4)
    gamma = 1.0 + 0.1 * jax.random.normal(kg, (c,), jnp.float32)
    beta = 0.1 * jax.random.normal(kb, (c,), jnp.float32)
    mean = 0.1 * jax.random.normal(km, (c,), jnp.float32)
    var = jax.random.uniform(kv, (c,), jnp.float32, minval=0.5, maxval=1.5)
    return gamma, beta, mean, var


def build_raw_params(key, ft, n_class):
    keys = iter(jax.random.split(key, 32))
    nk = lambda: next(keys)
    raw = {}
    specs = [(ft[4], ft[3], ft[3]), (ft[3], ft[2], ft[2]),
             (ft[2], ft[1], ft[1]), (ft[1], ft[0], ft[0])]
    for i, (c1, c2, co) in enumerate(specs, start=1):
        raw[f'up{i}'] = dict(
            conv1x1=make_conv(nk(), c1, c2, 1),
            conv1=make_conv(nk(), 2 * c2, co, 3), bn1=make_bn(nk(), co),
            conv2=make_conv(nk(), co, co, 3), bn2=make_bn(nk(), co))
    raw['head3'] = make_conv(nk(), ft[3], n_class, 3)
    raw['head2'] = make_conv(nk(), ft[2], n_class, 3)
    raw['head1'] = make_conv(nk(), ft[1], n_class, 3)
    raw['head0'] = make_conv(nk(), ft[0], n_class, 3)
    return raw


def _toeplitz_conv3x3(w_oihw, width, ci_lo, ci_hi):
    """Block-Toeplitz lane-space weights for a 3x3 'same' conv on lane-flat rows.

    mats[ky][win*Csub+ci, wout*Cout+co] = w[co, ci_lo+ci, ky, win-wout+1]
    (zero outside the 3-tap band -> horizontal zero padding is implicit).
    """
    w = np.asarray(w_oihw, np.float32)
    cout = int(w.shape[0])
    csub = ci_hi - ci_lo
    mats = np.zeros((3, width * csub, width * cout), np.float32)
    for ky in range(3):
        for wout in range(width):
            for kx in range(3):
                win = wout + kx - 1
                if 0 <= win < width:
                    mats[ky, win * csub:(win + 1) * csub,
                         wout * cout:(wout + 1) * cout] = w[:, ci_lo:ci_hi, ky, kx].T
    return mats


def _proj_upsample_weight(w11_oi, aw):
    """Fused lane-space weight for 1x1 conv followed by width-direction bilinear up."""
    w11 = np.asarray(w11_oi, np.float32)       # (C2, C1)
    aw = np.asarray(aw, np.float32)            # (W_out, w_in)
    t = np.einsum('Ww,oi->wiWo', aw, w11)      # (w_in, C1, W_out, C2)
    wi, c1, wo, c2 = t.shape
    return t.reshape(wi * c1, wo * c2)


def _fold_bn(bn, conv_bias):
    gamma, beta, mean, var = [np.asarray(t, np.float32) for t in bn]
    b = np.asarray(conv_bias, np.float32)
    s = gamma / np.sqrt(var + EPS)
    return s, beta + (b - mean) * s


def pack_params(raw, widths):
    """Repack torch-layout parameters into lane-space Pallas weights (per level)."""
    packed = []
    head_names = ['head3', 'head2', 'head1', 'head0']
    for lvl in range(4):
        r = raw[f'up{lvl + 1}']
        W = widths[lvl]

        w11, b11 = r['conv1x1']                         # (C2, C1, 1, 1), (C2,)
        C2 = int(w11.shape[0])
        aw = bilinear_matrix(W // 2, W)                 # (W, W//2)
        wp = _proj_upsample_weight(np.asarray(w11)[:, :, 0, 0], aw)
        bup = np.tile(np.asarray(b11, np.float32), W).reshape(1, W * C2)

        (w1, b1), bn1 = r['conv1'], r['bn1']
        Cout, Cin = int(w1.shape[0]), int(w1.shape[1])
        Ca = Cin // 2
        s1, bb1 = _fold_bn(bn1, b1)
        wa = _toeplitz_conv3x3(w1, W, 0, Ca)            # skip part of the concat
        wb = _toeplitz_conv3x3(w1, W, Ca, Cin)          # upsampled part of the concat

        (w2, b2), bn2 = r['conv2'], r['bn2']
        s2, bb2 = _fold_bn(bn2, b2)
        w2t = _toeplitz_conv3x3(w2, W, 0, Cout)

        wh, bh = raw[head_names[lvl]]
        wht = _toeplitz_conv3x3(wh, W, 0, Cout)

        tile = lambda v: np.tile(np.asarray(v, np.float32), W).reshape(1, -1)
        packed.append(dict(
            wp=jnp.asarray(wp, jnp.bfloat16), bup=jnp.asarray(bup, jnp.float32),
            wa=jnp.asarray(wa, jnp.bfloat16), wb=jnp.asarray(wb, jnp.bfloat16),
            s1=jnp.asarray(tile(s1), jnp.float32), b1=jnp.asarray(tile(bb1), jnp.float32),
            w2=jnp.asarray(w2t, jnp.bfloat16),
            s2=jnp.asarray(tile(s2), jnp.float32), b2=jnp.asarray(tile(bb2), jnp.float32),
            wh=jnp.asarray(wht, jnp.bfloat16), bh=jnp.asarray(tile(bh), jnp.float32)))
    return packed


# --------------------------------------------------------------------------------------
# Pure-JAX reference (torch semantics, bf16 conv operands / f32 accumulation)
# --------------------------------------------------------------------------------------

def _ref_conv(x, w, b, pad):
    y = lax.conv_general_dilated(
        x.astype(jnp.bfloat16), w.astype(jnp.bfloat16),
        window_strides=(1, 1), padding=((pad, pad), (pad, pad)),
        dimension_numbers=("NCHW", "OIHW", "NCHW"),
        preferred_element_type=jnp.float32)
    return y + b[None, :, None, None]


def _ref_bn_lrelu(y, bn):
    gamma, beta, mean, var = bn
    y = (y - mean[None, :, None, None]) / jnp.sqrt(var[None, :, None, None] + EPS)
    y = y * gamma[None, :, None, None] + beta[None, :, None, None]
    return jnp.where(y > 0, y, NEG_SLOPE * y)


def _ref_upblock(x_deep, x_skip, p):
    y = _ref_conv(x_deep, *p['conv1x1'], pad=0)
    h, w = y.shape[2], y.shape[3]
    y = jnp.einsum('ih,jw,nchw->ncij',
                   jnp.asarray(bilinear_matrix(h, 2 * h)),
                   jnp.asarray(bilinear_matrix(w, 2 * w)), y)
    y = jnp.concatenate([x_skip, y], axis=1)
    y = _ref_bn_lrelu(_ref_conv(y, *p['conv1'], pad=1), p['bn1'])
    y = _ref_bn_lrelu(_ref_conv(y, *p['conv2'], pad=1), p['bn2'])
    return y


def _ref_resize_nearest(x, out_hw):
    n, c, h, w = x.shape
    H, W = out_hw
    ri = (jnp.arange(H) * h) // H
    ci = (jnp.arange(W) * w) // W
    return x[:, :, ri][:, :, :, ci]


def reference_decoder_ds(features_nchw, shape, raw):
    x0, x1, x2, x3, x4 = features_nchw
    x = _ref_upblock(x4, x3, raw['up1'])
    dp3 = _ref_resize_nearest(_ref_conv(x, *raw['head3'], pad=1), shape)
    x = _ref_upblock(x, x2, raw['up2'])
    dp2 = _ref_resize_nearest(_ref_conv(x, *raw['head2'], pad=1), shape)
    x = _ref_upblock(x, x1, raw['up3'])
    dp1 = _ref_resize_nearest(_ref_conv(x, *raw['head1'], pad=1), shape)
    x = _ref_upblock(x, x0, raw['up4'])
    dp0 = _ref_conv(x, *raw['head0'], pad=1)
    return dp0, dp1, dp2, dp3


# --------------------------------------------------------------------------------------

if __name__ == "__main__":
    key = jax.random.PRNGKey(0)
    kfeat, kparam = jax.random.split(key)

    ft_chns = [4, 8, 16, 32, 64]
    n_class = 4
    N, H0, W0 = 2, 32, 32
    shape = (H0, W0)

    fkeys = jax.random.split(kfeat, 5)
    features = [jax.random.normal(
        fkeys[i], (N, ft_chns[i], H0 // (2 ** i), W0 // (2 ** i)), jnp.float32)
        for i in range(5)]

    raw = build_raw_params(kparam, ft_chns, n_class)
    widths = [features[3].shape[3], features[2].shape[3],
              features[1].shape[3], features[0].shape[3]]
    packed = pack_params(raw, widths)

    outs = jax.block_until_ready(decoder_ds_forward(features, shape, packed))
    refs = jax.block_until_ready(reference_decoder_ds(features, shape, raw))

    for got, want in zip(outs, refs):
        assert got.shape == (N, n_class, H0, W0), got.shape
        np.testing.assert_allclose(np.asarray(got), np.asarray(want),
                                   rtol=3e-2, atol=3e-2)

    print("KERNEL_OK")
</pallas_src>

<mosaic_0001>
module attributes {stable_mosaic.version = 11 : i64} {
  func.func @_upblock_kernel(%arg0: i32, %arg1: memref<2x2x128xbf16, #tpu.memory_space<vmem>>, %arg2: memref<2x6x128xbf16, #tpu.memory_space<vmem>>, %arg3: memref<128x128xbf16, #tpu.memory_space<vmem>>, %arg4: memref<8x4xf32, #tpu.memory_space<vmem>>, %arg5: memref<1x128xf32, #tpu.memory_space<vmem>>, %arg6: memref<3x128x128xbf16, #tpu.memory_space<vmem>>, %arg7: memref<3x128x128xbf16, #tpu.memory_space<vmem>>, %arg8: memref<1x128xf32, #tpu.memory_space<vmem>>, %arg9: memref<1x128xf32, #tpu.memory_space<vmem>>, %arg10: memref<3x128x128xbf16, #tpu.memory_space<vmem>>, %arg11: memref<1x128xf32, #tpu.memory_space<vmem>>, %arg12: memref<1x128xf32, #tpu.memory_space<vmem>>, %arg13: memref<3x128x16xbf16, #tpu.memory_space<vmem>>, %arg14: memref<1x16xf32, #tpu.memory_space<vmem>>, %arg15: memref<8x128xbf16, #tpu.memory_space<vmem>>, %arg16: memref<8x16xf32, #tpu.memory_space<vmem>>, %arg17: memref<2x6x128xbf16, #tpu.memory_space<vmem>>) attributes {dimension_semantics = [#tpu.dimension_semantics<parallel>], iteration_bounds = array<i64: 1>, scalar_prefetch = 0 : i64, scratch_operands = 1 : i64, tpu.core_type = #tpu.core_type<tc>, window_params = [{transform_indices = @transform_0, window_bounds = array<i64: 2, 2, 128>}, {transform_indices = @transform_1, window_bounds = array<i64: 2, 6, 128>}, {pipeline_mode = #tpu.pipeline_mode<synchronous>, transform_indices = @transform_2, window_bounds = array<i64: 128, 128>}, {pipeline_mode = #tpu.pipeline_mode<synchronous>, transform_indices = @transform_3, window_bounds = array<i64: 8, 4>}, {pipeline_mode = #tpu.pipeline_mode<synchronous>, transform_indices = @transform_4, window_bounds = array<i64: 1, 128>}, {pipeline_mode = #tpu.pipeline_mode<synchronous>, transform_indices = @transform_5, window_bounds = array<i64: 3, 128, 128>}, {pipeline_mode = #tpu.pipeline_mode<synchronous>, transform_indices = @transform_6, window_bounds = array<i64: 3, 128, 128>}, {pipeline_mode = #tpu.pipeline_mode<synchronous>, transform_indices = @transform_7, window_bounds = array<i64: 1, 128>}, {pipeline_mode = #tpu.pipeline_mode<synchronous>, transform_indices = @transform_8, window_bounds = array<i64: 1, 128>}, {pipeline_mode = #tpu.pipeline_mode<synchronous>, transform_indices = @transform_9, window_bounds = array<i64: 3, 128, 128>}, {pipeline_mode = #tpu.pipeline_mode<synchronous>, transform_indices = @transform_10, window_bounds = array<i64: 1, 128>}, {pipeline_mode = #tpu.pipeline_mode<synchronous>, transform_indices = @transform_11, window_bounds = array<i64: 1, 128>}, {pipeline_mode = #tpu.pipeline_mode<synchronous>, transform_indices = @transform_12, window_bounds = array<i64: 3, 128, 16>}, {pipeline_mode = #tpu.pipeline_mode<synchronous>, transform_indices = @transform_13, window_bounds = array<i64: 1, 16>}, {transform_indices = @transform_14, window_bounds = array<i64: 8, 128>}, {transform_indices = @transform_15, window_bounds = array<i64: 8, 16>}]} {
    %cst = arith.constant 0.000000e+00 : bf16
    %0 = vector.broadcast %cst : bf16 to vector<2x1x128xbf16>
    %c0 = arith.constant 0 : index
    %c0_0 = arith.constant 0 : index
    %c0_1 = arith.constant 0 : index
    %1 = vector.load %arg17[%c0, %c0_0, %c0_1] : memref<2x6x128xbf16, #tpu.memory_space<vmem>>, vector<2x1x128xbf16>
    tpu.vector_store %arg17[%c0, %c0_0, %c0_1], %0 {strides = array<i32>} : memref<2x6x128xbf16, #tpu.memory_space<vmem>>, vector<2x1x128xbf16>,
    %cst_2 = arith.constant 0.000000e+00 : bf16
    %2 = vector.broadcast %cst_2 : bf16 to vector<2x1x128xbf16>
    %c0_3 = arith.constant 0 : index
    %c5 = arith.constant 5 : index
    %c0_4 = arith.constant 0 : index
    %3 = vector.load %arg17[%c0_3, %c5, %c0_4] : memref<2x6x128xbf16, #tpu.memory_space<vmem>>, vector<2x1x128xbf16>
    tpu.vector_store %arg17[%c0_3, %c5, %c0_4], %2 {strides = array<i32>} : memref<2x6x128xbf16, #tpu.memory_space<vmem>>, vector<2x1x128xbf16>,
    %c0_5 = arith.constant 0 : index
    %c0_6 = arith.constant 0 : index
    %c0_7 = arith.constant 0 : index
    %4 = vector.load %arg1[%c0_5, %c0_6, %c0_7] : memref<2x2x128xbf16, #tpu.memory_space<vmem>>, vector<2x2x128xbf16>
    %5 = vector.shape_cast %4 : vector<2x2x128xbf16> to vector<4x128xbf16>
    %c0_8 = arith.constant 0 : index
    %c0_9 = arith.constant 0 : index
    %6 = vector.load %arg3[%c0_8, %c0_9] : memref<128x128xbf16, #tpu.memory_space<vmem>>, vector<128x128xbf16>
    %cst_10 = arith.constant dense<0.000000e+00> : vector<4x128xf32>
    %7 = tpu.matmul %5, %6, %cst_10 {dimension_numbers = #tpu.dot_dimension_numbers<[1], [0], [0], [1], [0, 0, 1, 1], [], []>} : vector<4x128xbf16>, vector<128x128xbf16>, vector<4x128xf32> -> vector<4x128xf32>
    %c0_11 = arith.constant 0 : index
    %c0_12 = arith.constant 0 : index
    %8 = vector.load %arg4[%c0_11, %c0_12] : memref<8x4xf32, #tpu.memory_space<vmem>>, vector<8x4xf32>
    %cst_13 = arith.constant dense<0.000000e+00> : vector<8x128xf32>
    %9 = tpu.matmul %8, %7, %cst_13 {dimension_numbers = #tpu.dot_dimension_numbers<[1], [0], [0], [1], [0, 0, 1, 1], [], []>} : vector<8x4xf32>, vector<4x128xf32>, vector<8x128xf32> -> vector<8x128xf32>
    %c0_14 = arith.constant 0 : index
    %c0_15 = arith.constant 0 : index
    %10 = vector.load %arg5[%c0_14, %c0_15] : memref<1x128xf32, #tpu.memory_space<vmem>>, vector<1x128xf32>
    %11 = vector.broadcast %10 : vector<1x128xf32> to vector<8x128xf32>
    %12 = arith.addf %9, %11 : vector<8x128xf32>
    %13 = vector.shape_cast %12 : vector<8x128xf32> to vector<2x4x128xf32>
    %14 = arith.truncf %13 : vector<2x4x128xf32> to vector<2x4x128xbf16>
    %c0_16 = arith.constant 0 : index
    %c1 = arith.constant 1 : index
    %c0_17 = arith.constant 0 : index
    %15 = vector.load %arg17[%c0_16, %c1, %c0_17] : memref<2x6x128xbf16, #tpu.memory_space<vmem>>, vector<2x4x128xbf16>
    tpu.vector_store %arg17[%c0_16, %c1, %c0_17], %14 {strides = array<i32>} : memref<2x6x128xbf16, #tpu.memory_space<vmem>>, vector<2x4x128xbf16>,
    %c0_18 = arith.constant 0 : index
    %c0_19 = arith.constant 0 : index
    %c0_20 = arith.constant 0 : index
    %16 = vector.load %arg2[%c0_18, %c0_19, %c0_20] : memref<2x6x128xbf16, #tpu.memory_space<vmem>>, vector<2x4x128xbf16>
    %17 = vector.shape_cast %16 : vector<2x4x128xbf16> to vector<8x128xbf16>
    %c0_21 = arith.constant 0 : index
    %c0_22 = arith.constant 0 : index
    %c0_23 = arith.constant 0 : index
    %18 = vector.load %arg6[%c0_21, %c0_22, %c0_23] : memref<3x128x128xbf16, #tpu.memory_space<vmem>>, vector<1x128x128xbf16>
    %19 = vector.shape_cast %18 : vector<1x128x128xbf16> to vector<128x128xbf16>
    %cst_24 = arith.constant dense<0.000000e+00> : vector<8x128xf32>
    %20 = tpu.matmul %17, %19, %cst_24 {dimension_numbers = #tpu.dot_dimension_numbers<[1], [0], [0], [1], [0, 0, 1, 1], [], []>} : vector<8x128xbf16>, vector<128x128xbf16>, vector<8x128xf32> -> vector<8x128xf32>
    %c0_25 = arith.constant 0 : index
    %c1_26 = arith.constant 1 : index
    %c0_27 = arith.constant 0 : index
    %21 = vector.load %arg2[%c0_25, %c1_26, %c0_27] : memref<2x6x128xbf16, #tpu.memory_space<vmem>>, vector<2x4x128xbf16>
    %22 = vector.shape_cast %21 : vector<2x4x128xbf16> to vector<8x128xbf16>
    %c1_28 = arith.constant 1 : index
    %c0_29 = arith.constant 0 : index
    %c0_30 = arith.constant 0 : index
    %23 = vector.load %arg6[%c1_28, %c0_29, %c0_30] : memref<3x128x128xbf16, #tpu.memory_space<vmem>>, vector<1x128x128xbf16>
    %24 = vector.shape_cast %23 : vector<1x128x128xbf16> to vector<128x128xbf16>
    %cst_31 = arith.constant dense<0.000000e+00> : vector<8x128xf32>
    %25 = tpu.matmul %22, %24, %cst_31 {dimension_numbers = #tpu.dot_dimension_numbers<[1], [0], [0], [1], [0, 0, 1, 1], [], []>} : vector<8x128xbf16>, vector<128x128xbf16>, vector<8x128xf32> -> vector<8x128xf32>
    %26 = arith.addf %20, %25 : vector<8x128xf32>
    %c0_32 = arith.constant 0 : index
    %c2 = arith.constant 2 : index
    %c0_33 = arith.constant 0 : index
    %27 = vector.load %arg2[%c0_32, %c2, %c0_33] : memref<2x6x128xbf16, #tpu.memory_space<vmem>>, vector<2x4x128xbf16>
    %28 = vector.shape_cast %27 : vector<2x4x128xbf16> to vector<8x128xbf16>
    %c2_34 = arith.constant 2 : index
    %c0_35 = arith.constant 0 : index
    %c0_36 = arith.constant 0 : index
    %29 = vector.load %arg6[%c2_34, %c0_35, %c0_36] : memref<3x128x128xbf16, #tpu.memory_space<vmem>>, vector<1x128x128xbf16>
    %30 = vector.shape_cast %29 : vector<1x128x128xbf16> to vector<128x128xbf16>
    %cst_37 = arith.constant dense<0.000000e+00> : vector<8x128xf32>
    %31 = tpu.matmul %28, %30, %cst_37 {dimension_numbers = #tpu.dot_dimension_numbers<[1], [0], [0], [1], [0, 0, 1, 1], [], []>} : vector<8x128xbf16>, vector<128x128xbf16>, vector<8x128xf32> -> vector<8x128xf32>
    %32 = arith.addf %26, %31 : vector<8x128xf32>
    %c0_38 = arith.constant 0 : index
    %c0_39 = arith.constant 0 : index
    %c0_40 = arith.constant 0 : index
    %33 = vector.load %arg17[%c0_38, %c0_39, %c0_40] : memref<2x6x128xbf16, #tpu.memory_space<vmem>>, vector<2x4x128xbf16>
    %34 = vector.shape_cast %33 : vector<2x4x128xbf16> to vector<8x128xbf16>
    %c0_41 = arith.constant 0 : index
    %c0_42 = arith.constant 0 : index
    %c0_43 = arith.constant 0 : index
    %35 = vector.load %arg7[%c0_41, %c0_42, %c0_43] : memref<3x128x128xbf16, #tpu.memory_space<vmem>>, vector<1x128x128xbf16>
    %36 = vector.shape_cast %35 : vector<1x128x128xbf16> to vector<128x128xbf16>
    %cst_44 = arith.constant dense<0.000000e+00> : vector<8x128xf32>
    %37 = tpu.matmul %34, %36, %cst_44 {dimension_numbers = #tpu.dot_dimension_numbers<[1], [0], [0], [1], [0, 0, 1, 1], [], []>} : vector<8x128xbf16>, vector<128x128xbf16>, vector<8x128xf32> -> vector<8x128xf32>
    %c0_45 = arith.constant 0 : index
    %c1_46 = arith.constant 1 : index
    %c0_47 = arith.constant 0 : index
    %38 = vector.load %arg17[%c0_45, %c1_46, %c0_47] : memref<2x6x128xbf16, #tpu.memory_space<vmem>>, vector<2x4x128xbf16>
    %39 = vector.shape_cast %38 : vector<2x4x128xbf16> to vector<8x128xbf16>
    %c1_48 = arith.constant 1 : index
    %c0_49 = arith.constant 0 : index
    %c0_50 = arith.constant 0 : index
    %40 = vector.load %arg7[%c1_48, %c0_49, %c0_50] : memref<3x128x128xbf16, #tpu.memory_space<vmem>>, vector<1x128x128xbf16>
    %41 = vector.shape_cast %40 : vector<1x128x128xbf16> to vector<128x128xbf16>
    %cst_51 = arith.constant dense<0.000000e+00> : vector<8x128xf32>
    %42 = tpu.matmul %39, %41, %cst_51 {dimension_numbers = #tpu.dot_dimension_numbers<[1], [0], [0], [1], [0, 0, 1, 1], [], []>} : vector<8x128xbf16>, vector<128x128xbf16>, vector<8x128xf32> -> vector<8x128xf32>
    %43 = arith.addf %37, %42 : vector<8x128xf32>
    %c0_52 = arith.constant 0 : index
    %c2_53 = arith.constant 2 : index
    %c0_54 = arith.constant 0 : index
    %44 = vector.load %arg17[%c0_52, %c2_53, %c0_54] : memref<2x6x128xbf16, #tpu.memory_space<vmem>>, vector<2x4x128xbf16>
    %45 = vector.shape_cast %44 : vector<2x4x128xbf16> to vector<8x128xbf16>
    %c2_55 = arith.constant 2 : index
    %c0_56 = arith.constant 0 : index
    %c0_57 = arith.constant 0 : index
    %46 = vector.load %arg7[%c2_55, %c0_56, %c0_57] : memref<3x128x128xbf16, #tpu.memory_space<vmem>>, vector<1x128x128xbf16>
    %47 = vector.shape_cast %46 : vector<1x128x128xbf16> to vector<128x128xbf16>
    %cst_58 = arith.constant dense<0.000000e+00> : vector<8x128xf32>
    %48 = tpu.matmul %45, %47, %cst_58 {dimension_numbers = #tpu.dot_dimension_numbers<[1], [0], [0], [1], [0, 0, 1, 1], [], []>} : vector<8x128xbf16>, vector<128x128xbf16>, vector<8x128xf32> -> vector<8x128xf32>
    %49 = arith.addf %43, %48 : vector<8x128xf32>
    %50 = arith.addf %32, %49 : vector<8x128xf32>
    %c0_59 = arith.constant 0 : index
    %c0_60 = arith.constant 0 : index
    %51 = vector.load %arg8[%c0_59, %c0_60] : memref<1x128xf32, #tpu.memory_space<vmem>>, vector<1x128xf32>
    %52 = vector.broadcast %51 : vector<1x128xf32> to vector<8x128xf32>
    %53 = arith.mulf %50, %52 : vector<8x128xf32>
    %c0_61 = arith.constant 0 : index
    %c0_62 = arith.constant 0 : index
    %54 = vector.load %arg9[%c0_61, %c0_62] : memref<1x128xf32, #tpu.memory_space<vmem>>, vector<1x128xf32>
    %55 = vector.broadcast %54 : vector<1x128xf32> to vector<8x128xf32>
    %56 = arith.addf %53, %55 : vector<8x128xf32>
    %cst_63 = arith.constant 0.000000e+00 : f32
    %57 = vector.broadcast %cst_63 : f32 to vector<8x128xf32>
    %58 = arith.cmpf ogt, %56, %57 : vector<8x128xf32>
    %cst_64 = arith.constant 0.00999999977 : f32
    %59 = vector.broadcast %cst_64 : f32 to vector<8x128xf32>
    %60 = arith.mulf %59, %56 : vector<8x128xf32>
    %61 = arith.select %58, %56, %60 : vector<8x128xi1>, vector<8x128xf32>
    %62 = vector.shape_cast %61 : vector<8x128xf32> to vector<2x4x128xf32>
    %63 = arith.truncf %62 : vector<2x4x128xf32> to vector<2x4x128xbf16>
    %c0_65 = arith.constant 0 : index
    %c1_66 = arith.constant 1 : index
    %c0_67 = arith.constant 0 : index
    %64 = vector.load %arg17[%c0_65, %c1_66, %c0_67] : memref<2x6x128xbf16, #tpu.memory_space<vmem>>, vector<2x4x128xbf16>
    tpu.vector_store %arg17[%c0_65, %c1_66, %c0_67], %63 {strides = array<i32>} : memref<2x6x128xbf16, #tpu.memory_space<vmem>>, vector<2x4x128xbf16>,
    %c0_68 = arith.constant 0 : index
    %c0_69 = arith.constant 0 : index
    %c0_70 = arith.constant 0 : index
    %65 = vector.load %arg17[%c0_68, %c0_69, %c0_70] : memref<2x6x128xbf16, #tpu.memory_space<vmem>>, vector<2x4x128xbf16>
    %66 = vector.shape_cast %65 : vector<2x4x128xbf16> to vector<8x128xbf16>
    %c0_71 = arith.constant 0 : index
    %c0_72 = arith.constant 0 : index
    %c0_73 = arith.constant 0 : index
    %67 = vector.load %arg10[%c0_71, %c0_72, %c0_73] : memref<3x128x128xbf16, #tpu.memory_space<vmem>>, vector<1x128x128xbf16>
    %68 = vector.shape_cast %67 : vector<1x128x128xbf16> to vector<128x128xbf16>
    %cst_74 = arith.constant dense<0.000000e+00> : vector<8x128xf32>
    %69 = tpu.matmul %66, %68, %cst_74 {dimension_numbers = #tpu.dot_dimension_numbers<[1], [0], [0], [1], [0, 0, 1, 1], [], []>} : vector<8x128xbf16>, vector<128x128xbf16>, vector<8x128xf32> -> vector<8x128xf32>
    %c0_75 = arith.constant 0 : index
    %c1_76 = arith.constant 1 : index
    %c0_77 = arith.constant 0 : index
    %70 = vector.load %arg17[%c0_75, %c1_76, %c0_77] : memref<2x6x128xbf16, #tpu.memory_space<vmem>>, vector<2x4x128xbf16>
    %71 = vector.shape_cast %70 : vector<2x4x128xbf16> to vector<8x128xbf16>
    %c1_78 = arith.constant 1 : index
    %c0_79 = arith.constant 0 : index
    %c0_80 = arith.constant 0 : index
    %72 = vector.load %arg10[%c1_78, %c0_79, %c0_80] : memref<3x128x128xbf16, #tpu.memory_space<vmem>>, vector<1x128x128xbf16>
    %73 = vector.shape_cast %72 : vector<1x128x128xbf16> to vector<128x128xbf16>
    %cst_81 = arith.constant dense<0.000000e+00> : vector<8x128xf32>
    %74 = tpu.matmul %71, %73, %cst_81 {dimension_numbers = #tpu.dot_dimension_numbers<[1], [0], [0], [1], [0, 0, 1, 1], [], []>} : vector<8x128xbf16>, vector<128x128xbf16>, vector<8x128xf32> -> vector<8x128xf32>
    %75 = arith.addf %69, %74 : vector<8x128xf32>
    %c0_82 = arith.constant 0 : index
    %c2_83 = arith.constant 2 : index
    %c0_84 = arith.constant 0 : index
    %76 = vector.load %arg17[%c0_82, %c2_83, %c0_84] : memref<2x6x128xbf16, #tpu.memory_space<vmem>>, vector<2x4x128xbf16>
    %77 = vector.shape_cast %76 : vector<2x4x128xbf16> to vector<8x128xbf16>
    %c2_85 = arith.constant 2 : index
    %c0_86 = arith.constant 0 : index
    %c0_87 = arith.constant 0 : index
    %78 = vector.load %arg10[%c2_85, %c0_86, %c0_87] : memref<3x128x128xbf16, #tpu.memory_space<vmem>>, vector<1x128x128xbf16>
    %79 = vector.shape_cast %78 : vector<1x128x128xbf16> to vector<128x128xbf16>
    %cst_88 = arith.constant dense<0.000000e+00> : vector<8x128xf32>
    %80 = tpu.matmul %77, %79, %cst_88 {dimension_numbers = #tpu.dot_dimension_numbers<[1], [0], [0], [1], [0, 0, 1, 1], [], []>} : vector<8x128xbf16>, vector<128x128xbf16>, vector<8x128xf32> -> vector<8x128xf32>
    %81 = arith.addf %75, %80 : vector<8x128xf32>
    %c0_89 = arith.constant 0 : index
    %c0_90 = arith.constant 0 : index
    %82 = vector.load %arg11[%c0_89, %c0_90] : memref<1x128xf32, #tpu.memory_space<vmem>>, vector<1x128xf32>
    %83 = vector.broadcast %82 : vector<1x128xf32> to vector<8x128xf32>
    %84 = arith.mulf %81, %83 : vector<8x128xf32>
    %c0_91 = arith.constant 0 : index
    %c0_92 = arith.constant 0 : index
    %85 = vector.load %arg12[%c0_91, %c0_92] : memref<1x128xf32, #tpu.memory_space<vmem>>, vector<1x128xf32>
    %86 = vector.broadcast %85 : vector<1x128xf32> to vector<8x128xf32>
    %87 = arith.addf %84, %86 : vector<8x128xf32>
    %cst_93 = arith.constant 0.000000e+00 : f32
    %88 = vector.broadcast %cst_93 : f32 to vector<8x128xf32>
    %89 = arith.cmpf ogt, %87, %88 : vector<8x128xf32>
    %cst_94 = arith.constant 0.00999999977 : f32
    %90 = vector.broadcast %cst_94 : f32 to vector<8x128xf32>
    %91 = arith.mulf %90, %87 : vector<8x128xf32>
    %92 = arith.select %89, %87, %91 : vector<8x128xi1>, vector<8x128xf32>
    %93 = arith.truncf %92 : vector<8x128xf32> to vector<8x128xbf16>
    %c0_95 = arith.constant 0 : index
    %c0_96 = arith.constant 0 : index
    %94 = vector.load %arg15[%c0_95, %c0_96] : memref<8x128xbf16, #tpu.memory_space<vmem>>, vector<8x128xbf16>
    tpu.vector_store %arg15[%c0_95, %c0_96], %93 {strides = array<i32>} : memref<8x128xbf16, #tpu.memory_space<vmem>>, vector<8x128xbf16>,
    %95 = vector.shape_cast %93 : vector<8x128xbf16> to vector<2x4x128xbf16>
    %c0_97 = arith.constant 0 : index
    %c1_98 = arith.constant 1 : index
    %c0_99 = arith.constant 0 : index
    %96 = vector.load %arg17[%c0_97, %c1_98, %c0_99] : memref<2x6x128xbf16, #tpu.memory_space<vmem>>, vector<2x4x128xbf16>
    tpu.vector_store %arg17[%c0_97, %c1_98, %c0_99], %95 {strides = array<i32>} : memref<2x6x128xbf16, #tpu.memory_space<vmem>>, vector<2x4x128xbf16>,
    %c0_100 = arith.constant 0 : index
    %c0_101 = arith.constant 0 : index
    %c0_102 = arith.constant 0 : index
    %97 = vector.load %arg17[%c0_100, %c0_101, %c0_102] : memref<2x6x128xbf16, #tpu.memory_space<vmem>>, vector<2x4x128xbf16>
    %98 = vector.shape_cast %97 : vector<2x4x128xbf16> to vector<8x128xbf16>
    %c0_103 = arith.constant 0 : index
    %c0_104 = arith.constant 0 : index
    %c0_105 = arith.constant 0 : index
    %99 = vector.load %arg13[%c0_103, %c0_104, %c0_105] : memref<3x128x16xbf16, #tpu.memory_space<vmem>>, vector<1x128x16xbf16>
    %100 = vector.shape_cast %99 : vector<1x128x16xbf16> to vector<128x16xbf16>
    %cst_106 = arith.constant dense<0.000000e+00> : vector<8x16xf32>
    %101 = tpu.matmul %98, %100, %cst_106 {dimension_numbers = #tpu.dot_dimension_numbers<[1], [0], [0], [1], [0, 0, 1, 1], [], []>} : vector<8x128xbf16>, vector<128x16xbf16>, vector<8x16xf32> -> vector<8x16xf32>
    %c0_107 = arith.constant 0 : index
    %c1_108 = arith.constant 1 : index
    %c0_109 = arith.constant 0 : index
    %102 = vector.load %arg17[%c0_107, %c1_108, %c0_109] : memref<2x6x128xbf16, #tpu.memory_space<vmem>>, vector<2x4x128xbf16>
    %103 = vector.shape_cast %102 : vector<2x4x128xbf16> to vector<8x128xbf16>
    %c1_110 = arith.constant 1 : index
    %c0_111 = arith.constant 0 : index
    %c0_112 = arith.constant 0 : index
    %104 = vector.load %arg13[%c1_110, %c0_111, %c0_112] : memref<3x128x16xbf16, #tpu.memory_space<vmem>>, vector<1x128x16xbf16>
    %105 = vector.shape_cast %104 : vector<1x128x16xbf16> to vector<128x16xbf16>
    %cst_113 = arith.constant dense<0.000000e+00> : vector<8x16xf32>
    %106 = tpu.matmul %103, %105, %cst_113 {dimension_numbers = #tpu.dot_dimension_numbers<[1], [0], [0], [1], [0, 0, 1, 1], [], []>} : vector<8x128xbf16>, vector<128x16xbf16>, vector<8x16xf32> -> vector<8x16xf32>
    %107 = arith.addf %101, %106 : vector<8x16xf32>
    %c0_114 = arith.constant 0 : index
    %c2_115 = arith.constant 2 : index
    %c0_116 = arith.constant 0 : index
    %108 = vector.load %arg17[%c0_114, %c2_115, %c0_116] : memref<2x6x128xbf16, #tpu.memory_space<vmem>>, vector<2x4x128xbf16>
    %109 = vector.shape_cast %108 : vector<2x4x128xbf16> to vector<8x128xbf16>
    %c2_117 = arith.constant 2 : index
    %c0_118 = arith.constant 0 : index
    %c0_119 = arith.constant 0 : index
    %110 = vector.load %arg13[%c2_117, %c0_118, %c0_119] : memref<3x128x16xbf16, #tpu.memory_space<vmem>>, vector<1x128x16xbf16>
    %111 = vector.shape_cast %110 : vector<1x128x16xbf16> to vector<128x16xbf16>
    %cst_120 = arith.constant dense<0.000000e+00> : vector<8x16xf32>
    %112 = tpu.matmul %109, %111, %cst_120 {dimension_numbers = #tpu.dot_dimension_numbers<[1], [0], [0], [1], [0, 0, 1, 1], [], []>} : vector<8x128xbf16>, vector<128x16xbf16>, vector<8x16xf32> -> vector<8x16xf32>
    %113 = arith.addf %107, %112 : vector<8x16xf32>
    %c0_121 = arith.constant 0 : index
    %c0_122 = arith.constant 0 : index
    %114 = vector.load %arg14[%c0_121, %c0_122] : memref<1x16xf32, #tpu.memory_space<vmem>>, vector<1x16xf32>
    %115 = vector.broadcast %114 : vector<1x16xf32> to vector<8x16xf32>
    %116 = arith.addf %113, %115 : vector<8x16xf32>
    %c0_123 = arith.constant 0 : index
    %c0_124 = arith.constant 0 : index
    %117 = vector.load %arg16[%c0_123, %c0_124] : memref<8x16xf32, #tpu.memory_space<vmem>>, vector<8x16xf32>
    tpu.vector_store %arg16[%c0_123, %c0_124], %116 {strides = array<i32>} : memref<8x16xf32, #tpu.memory_space<vmem>>, vector<8x16xf32>,
    return
  }
  func.func @transform_0(%arg0: i32) -> (i32, i32, i32) {
    %c0_i32 = arith.constant 0 : i32
    %c0_i32_0 = arith.constant 0 : i32
    %c0_i32_1 = arith.constant 0 : i32
    return %arg0, %c0_i32, %c0_i32_0 : i32, i32, i32
  }
  func.func @transform_1(%arg0: i32) -> (i32, i32, i32) {
    %c0_i32 = arith.constant 0 : i32
    %c0_i32_0 = arith.constant 0 : i32
    %c0_i32_1 = arith.constant 0 : i32
    return %arg0, %c0_i32, %c0_i32_0 : i32, i32, i32
  }
  func.func @transform_2(%arg0: i32) -> (i32, i32) {
    %c0_i32 = arith.constant 0 : i32
    %c0_i32_0 = arith.constant 0 : i32
    %c0_i32_1 = arith.constant 0 : i32
    return %c0_i32, %c0_i32_0 : i32, i32
  }
  func.func @transform_3(%arg0: i32) -> (i32, i32) {
    %c0_i32 = arith.constant 0 : i32
    %c0_i32_0 = arith.constant 0 : i32
    %c0_i32_1 = arith.constant 0 : i32
    return %c0_i32, %c0_i32_0 : i32, i32
  }
  func.func @transform_4(%arg0: i32) -> (i32, i32) {
    %c0_i32 = arith.constant 0 : i32
    %c0_i32_0 = arith.constant 0 : i32
    %c0_i32_1 = arith.constant 0 : i32
    return %c0_i32, %c0_i32_0 : i32, i32
  }
  func.func @transform_5(%arg0: i32) -> (i32, i32, i32) {
    %c0_i32 = arith.constant 0 : i32
    %c0_i32_0 = arith.constant 0 : i32
    %c0_i32_1 = arith.constant 0 : i32
    %c0_i32_2 = arith.constant 0 : i32
    return %c0_i32, %c0_i32_0, %c0_i32_1 : i32, i32, i32
  }
  func.func @transform_6(%arg0: i32) -> (i32, i32, i32) {
    %c0_i32 = arith.constant 0 : i32
    %c0_i32_0 = arith.constant 0 : i32
    %c0_i32_1 = arith.constant 0 : i32
    %c0_i32_2 = arith.constant 0 : i32
    return %c0_i32, %c0_i32_0, %c0_i32_1 : i32, i32, i32
  }
  func.func @transform_7(%arg0: i32) -> (i32, i32) {
    %c0_i32 = arith.constant 0 : i32
    %c0_i32_0 = arith.constant 0 : i32
    %c0_i32_1 = arith.constant 0 : i32
    return %c0_i32, %c0_i32_0 : i32, i32
  }
  func.func @transform_8(%arg0: i32) -> (i32, i32) {
    %c0_i32 = arith.constant 0 : i32
    %c0_i32_0 = arith.constant 0 : i32
    %c0_i32_1 = arith.constant 0 : i32
    return %c0_i32, %c0_i32_0 : i32, i32
  }
  func.func @transform_9(%arg0: i32) -> (i32, i32, i32) {
    %c0_i32 = arith.constant 0 : i32
    %c0_i32_0 = arith.constant 0 : i32
    %c0_i32_1 = arith.constant 0 : i32
    %c0_i32_2 = arith.constant 0 : i32
    return %c0_i32, %c0_i32_0, %c0_i32_1 : i32, i32, i32
  }
  func.func @transform_10(%arg0: i32) -> (i32, i32) {
    %c0_i32 = arith.constant 0 : i32
    %c0_i32_0 = arith.constant 0 : i32
    %c0_i32_1 = arith.constant 0 : i32
    return %c0_i32, %c0_i32_0 : i32, i32
  }
  func.func @transform_11(%arg0: i32) -> (i32, i32) {
    %c0_i32 = arith.constant 0 : i32
    %c0_i32_0 = arith.constant 0 : i32
    %c0_i32_1 = arith.constant 0 : i32
    return %c0_i32, %c0_i32_0 : i32, i32
  }
  func.func @transform_12(%arg0: i32) -> (i32, i32, i32) {
    %c0_i32 = arith.constant 0 : i32
    %c0_i32_0 = arith.constant 0 : i32
    %c0_i32_1 = arith.constant 0 : i32
    %c0_i32_2 = arith.constant 0 : i32
    return %c0_i32, %c0_i32_0, %c0_i32_1 : i32, i32, i32
  }
  func.func @transform_13(%arg0: i32) -> (i32, i32) {
    %c0_i32 = arith.constant 0 : i32
    %c0_i32_0 = arith.constant 0 : i32
    %c0_i32_1 = arith.constant 0 : i32
    return %c0_i32, %c0_i32_0 : i32, i32
  }
  func.func @transform_14(%arg0: i32) -> (i32, i32) {
    %c0_i32 = arith.constant 0 : i32
    %c0_i32_0 = arith.constant 0 : i32
    return %arg0, %c0_i32 : i32, i32
  }
  func.func @transform_15(%arg0: i32) -> (i32, i32) {
    %c0_i32 = arith.constant 0 : i32
    %c0_i32_0 = arith.constant 0 : i32
    return %arg0, %c0_i32 : i32, i32
  }
}

</mosaic_0001>

<bundles_post_ra>
// kernel: tpu_custom_call.1
= control target key start
LH: loop header
LB: loop body
LE: loop exit
PB: predicated region body
PF: predicated region fallthrough
CT: control target
= control target key end

     0   :  { %21 = vsyncpa [#allocation4], 0  ;;  %s3783_s0 = inlined_call_operand.vmem [shape: bf16[2,2,128], index: 0, kind: input, shape index: {}]   ;;  %s3784_s1 = inlined_call_operand.vmem [shape: bf16[2,6,128], index: 1, kind: input, shape index: {}]   ;;  %s3785_s2 = inlined_call_operand.vmem [shape: bf16[128,128], index: 2, kind: input, shape index: {}]   ;;  %s3786_s3 = inlined_call_operand.vmem [shape: f32[8,4], index: 3, kind: input, shape index: {}]   ;;  %s3787_s4 = inlined_call_operand.vmem [shape: f32[1,128], index: 4, kind: input, shape index: {}]   ;;  %s3788_s5 = inlined_call_operand.vmem [shape: bf16[3,128,128], index: 5, kind: input, shape index: {}]   ;;  %s3789_s6 = inlined_call_operand.hbm [shape: bf16[3,128,128], index: 6, kind: input, shape index: {}]   ;;  %s3790_s7 = inlined_call_operand.hbm [shape: f32[1,128], index: 7, kind: input, shape index: {}]   ;;  %s3791_s8 = inlined_call_operand.hbm [shape: f32[1,128], index: 8, kind: input, shape index: {}]   ;;  %s3792_s9 = inlined_call_operand.hbm [shape: bf16[3,128,128], index: 9, kind: input, shape index: {}]   ;;  %s3793_s10 = inlined_call_operand.hbm [shape: f32[1,128], index: 10, kind: input, shape index: {}]   ;;  %s3794_s11 = inlined_call_operand.hbm [shape: f32[1,128], index: 11, kind: input, shape index: {}]   ;;  %s3795_s12 = inlined_call_operand.vmem [shape: bf16[3,128,16], index: 12, kind: input, shape index: {}]   ;;  %s3796_s13 = inlined_call_operand.vmem [shape: f32[1,16], index: 13, kind: input, shape index: {}]   ;;  %s3797_s14 = inlined_call_operand.hbm [shape: bf16[8,128], index: 14, kind: output, shape index: {0}]   ;;  %s3798_s15 = inlined_call_operand.hbm [shape: f32[8,16], index: 15, kind: output, shape index: {1}]  }
   0x1   :  { %22 = vsyncpa [#allocation7], 0 }
   0x2   :  { %23 = vsyncpa [#allocation10], 0 }
   0x3   :  { %24 = vsyncpa [#allocation13], 0 }
   0x4   :  { %25 = vsyncpa [#allocation5], 0 }
   0x5   :  { %26 = vsyncpa [#allocation16], 0  ;;  %s3185_s18 = smov [#allocation6]   ;;  %s2997_s22 = scalar_lea.hbm %s3790_s7, 16 }
   0x6   :  { %s57_s19 = sshll.u32 %s3185_s18, 4  ;;  %p2998_p0 = scmp.ne.s32.totalorder %s3790_s7, %s2997_s22  ;;  %s58_s19 = int_to_ptr.vmem [resolvable:$true] %s57_s19 }
   0x7   :  { %p3001_p1 = scmp.lt.u32.totalorder %s2997_s22, %s3790_s7 }
   0x9   :  { %p3003_p2 = pnand %p3001_p1, %p2998_p0 }
   0xb   :  { %3006 = shalt.err (!%p3003_p2)
}
   0xc   :  { %s3007_s27 = scalar_lea.vmem %s58_s19, 16  ;;  %s3011_s28 = scalar_lea.vmem %s58_s19, 32 }
   0xd   :  { %p3008_p3 = scmp.ne.s32.totalorder %s58_s19, %s3007_s27  ;;  %p3012_p4 = scmp.lt.s32.totalorder %s58_s19, %s58_s19 }
   0xe   :  { %p3013_p5 = scmp.lt.s32.totalorder %s3011_s28, %s3007_s27 }
  0x10   :  { %p3014_p6 = por %p3013_p5, %p3012_p4 }
  0x12   :  { %p3015_p7 = pnand %p3014_p6, %p3008_p3 }
  0x14   :  { %3018 = shalt.err (!%p3015_p7)
}
  0x15   :  { %60 = dma.hbm_to_vmem [thread:$0]  %s3790_s7, 16, %s58_s19, [#allocation7]  }
  0x16   :  { %s3186_s16 = smov [#allocation9]   ;;  %s3187_s18 = smov [#allocation3]  }
  0x17   :  { %s76_s17 = sshll.u32 %s3186_s16, 4  ;;  %s44_s20 = sshll.u32 %s3187_s18, 4  ;;  %s77_s17 = int_to_ptr.vmem [resolvable:$true] %s76_s17  ;;  %s45_s20 = int_to_ptr.vmem [resolvable:$true] %s44_s20 }
  0x18   :  { %s3019_s23 = scalar_lea.hbm %s3792_s9, 3072 }
  0x19   :  { %p3020_p8 = scmp.ne.s32.totalorder %s3792_s9, %s3019_s23  ;;  %p3023_p9 = scmp.lt.u32.totalorder %s3019_s23, %s3792_s9 }
  0x1b   :  { %p3025_p10 = pnand %p3023_p9, %p3020_p8 }
  0x1d   :  { %3028 = shalt.err (!%p3025_p10)
}
  0x1e   :  { %s3029_s7 = scalar_lea.vmem %s77_s17, 3072  ;;  %p3034_p12 = scmp.lt.s32.totalorder %s77_s17, %s77_s17 }
  0x1f   :  { %p3030_p11 = scmp.ne.s32.totalorder %s77_s17, %s3029_s7  ;;  %p3035_p13 = scmp.lt.s32.totalorder %s3029_s7, %s3029_s7 }
  0x21   :  { %p3036_p0 = por %p3035_p13, %p3034_p12 }
  0x23   :  { %p3037_p1 = pnand %p3036_p0, %p3030_p11 }
  0x25   :  { %3040 = shalt.err (!%p3037_p1)
}
  0x26   :  { %s3188_s19 = smov 64   ;;  %s3189_s28 = smov 4  }
  0x27   :  { %82 = dma.hbm_to_vmem [thread:$0]  %s3792_s9, 3072, %s77_s17, [#allocation10], %s3188_s19, %s3188_s19, %s3189_s28  }
  0x28   :  { %s3041_s21 = scalar_lea.hbm %s3789_s6, 3072 }
  0x29   :  { %p3042_p2 = scmp.ne.s32.totalorder %s3789_s6, %s3041_s21  ;;  %p3045_p3 = scmp.lt.u32.totalorder %s3041_s21, %s3789_s6 }
  0x2b   :  { %p3047_p4 = pnand %p3045_p3, %p3042_p2 }
  0x2d   :  { %3050 = shalt.err (!%p3047_p4)
}
  0x2e   :  { %s3051_s26 = scalar_lea.vmem %s45_s20, 3072  ;;  %p3056_p6 = scmp.lt.s32.totalorder %s45_s20, %s45_s20 }
  0x2f   :  { %p3052_p5 = scmp.ne.s32.totalorder %s45_s20, %s3051_s26  ;;  %p3057_p7 = scmp.lt.s32.totalorder %s3051_s26, %s3051_s26 }
  0x31   :  { %p3058_p8 = por %p3057_p7, %p3056_p6 }
  0x33   :  { %p3059_p9 = pnand %p3058_p8, %p3052_p5 }
  0x35   :  { %3062 = shalt.err (!%p3059_p9)
}
  0x36   :  { %50 = dma.hbm_to_vmem [thread:$0]  %s3789_s6, 3072, %s45_s20, [#allocation4], %s3188_s19, %s3188_s19, %s3189_s28  }
  0x37   :  { %s3190_s27 = smov [#allocation8]   ;;  %s3191_s29 = smov [#allocation11]  }
  0x38   :  { %s67_s7 = sshll.u32 %s3190_s27, 4  ;;  %s89_s30 = sshll.u32 %s3191_s29, 4  ;;  %s68_s7 = int_to_ptr.vmem [resolvable:$true] %s67_s7  ;;  %s90_s30 = int_to_ptr.vmem [resolvable:$true] %s89_s30 }
  0x39   :  { %s3063_s21 = scalar_lea.hbm %s3791_s8, 16 }
  0x3a   :  { %p3064_p10 = scmp.ne.s32.totalorder %s3791_s8, %s3063_s21  ;;  %p3067_p11 = scmp.lt.u32.totalorder %s3063_s21, %s3791_s8 }
  0x3c   :  { %p3069_p12 = pnand %p3067_p11, %p3064_p10 }
  0x3e   :  { %3072 = shalt.err (!%p3069_p12)
}
  0x3f   :  { %s3073_s6 = scalar_lea.vmem %s68_s7, 16  ;;  %s3077_s20 = scalar_lea.vmem %s68_s7, 32 }
  0x40   :  { %p3074_p13 = scmp.ne.s32.totalorder %s68_s7, %s3073_s6  ;;  %p3078_p0 = scmp.lt.s32.totalorder %s68_s7, %s68_s7 }
  0x41   :  { %p3079_p1 = scmp.lt.s32.totalorder %s3077_s20, %s3073_s6 }
  0x43   :  { %p3080_p2 = por %p3079_p1, %p3078_p0 }
  0x45   :  { %p3081_p3 = pnand %p3080_p2, %p3074_p13 }
  0x47   :  { %3084 = shalt.err (!%p3081_p3)
}
  0x48   :  { %70 = dma.hbm_to_vmem [thread:$0]  %s3791_s8, 16, %s68_s7, [#allocation7]  }
  0x49   :  { %s3085_s17 = scalar_lea.hbm %s3793_s10, 16 }
  0x4a   :  { %p3086_p4 = scmp.ne.s32.totalorder %s3793_s10, %s3085_s17  ;;  %p3089_p5 = scmp.lt.u32.totalorder %s3085_s17, %s3793_s10 }
  0x4c   :  { %p3091_p6 = pnand %p3089_p5, %p3086_p4 }
  0x4e   :  { %3094 = shalt.err (!%p3091_p6)
}
  0x4f   :  { %s3095_s21 = scalar_lea.vmem %s90_s30, 16  ;;  %s3099_s22 = scalar_lea.vmem %s90_s30, 32 }
  0x50   :  { %p3096_p7 = scmp.ne.s32.totalorder %s90_s30, %s3095_s21  ;;  %p3100_p8 = scmp.lt.s32.totalorder %s90_s30, %s90_s30 }
  0x51   :  { %p3101_p9 = scmp.lt.s32.totalorder %s3099_s22, %s3095_s21 }
  0x53   :  { %p3102_p10 = por %p3101_p9, %p3100_p8 }
  0x55   :  { %p3103_p11 = pnand %p3102_p10, %p3096_p7 }
  0x57   :  { %3106 = shalt.err (!%p3103_p11)
}
  0x58   :  { %92 = dma.hbm_to_vmem [thread:$0]  %s3793_s10, 16, %s90_s30, [#allocation10]  }
  0x59   :  { %s3192_s23 = smov [#allocation12]   ;;  %s3107_s20 = scalar_lea.hbm %s3794_s11, 16 }
  0x5a   :  { %s99_s24 = sshll.u32 %s3192_s23, 4  ;;  %p3108_p12 = scmp.ne.s32.totalorder %s3794_s11, %s3107_s20  ;;  %s100_s24 = int_to_ptr.vmem [resolvable:$true] %s99_s24 }
  0x5b   :  { %p3111_p13 = scmp.lt.u32.totalorder %s3107_s20, %s3794_s11 }
  0x5d   :  { %p3113_p0 = pnand %p3111_p13, %p3108_p12 }
  0x5f   :  { %3116 = shalt.err (!%p3113_p0)
}
  0x60   :  { %s3117_s17 = scalar_lea.vmem %s100_s24, 16  ;;  %s3121_s10 = scalar_lea.vmem %s100_s24, 32 }
  0x61   :  { %p3118_p1 = scmp.ne.s32.totalorder %s100_s24, %s3117_s17  ;;  %p3122_p2 = scmp.lt.s32.totalorder %s100_s24, %s100_s24 }
  0x62   :  { %p3123_p3 = scmp.lt.s32.totalorder %s3121_s10, %s3117_s17 }
  0x64   :  { %p3124_p4 = por %p3123_p3, %p3122_p2 }
  0x66   :  { %p3125_p5 = pnand %p3124_p4, %p3118_p1 }
  0x68   :  { %3128 = shalt.err (!%p3125_p5)
}
  0x69   :  { %102 = dma.hbm_to_vmem [thread:$0]  %s3794_s11, 16, %s100_s24, [#allocation13]  }
  0x6a   :  { %3173 = dma.done.wait [#allocation4], 3072  }
  0x6b   :  { %3174 = vsyncadd [#allocation4], 4294964224 }
  0x6c   :  { %3175 = dma.done.wait [#allocation7], 32  }
  0x6d   :  { %3176 = vsyncadd [#allocation7], 4294967264 }
  0x6e   :  { %3177 = dma.done.wait [#allocation10], 3088  }
  0x6f   :  { %3178 = vsyncadd [#allocation10], 4294964208 }
  0x70   :  { %3179 = dma.done.wait [#allocation13], 16  }
  0x71   :  { %3180 = vsyncadd [#allocation13], 4294967280  ;;  %v3193_v0 = vmov 0.0   ;;  %vm3194_vm0 = vmmov 0   ;;  %v2885_v1 = vld [vmem:[%s3785_s2] sm:$0xff]   ;;  %v2886_v2 = vld [vmem:[%s3785_s2 + $0x8] sm:$0xff]   ;;  %v168_v3 = vlaneseq }
  0x72   :  { %2578 = vmatprep.subr.bf16.mxu0 %v3193_v0  ;;  %2594 = vmatprep.mubr.msk.bf16.mxu0 %vm3194_vm0, %v3193_v0  ;;  %v2887_v4 = vld [vmem:[%s3785_s2 + $0x10] sm:$0xff]   ;;  %v2888_v5 = vld [vmem:[%s3785_s2 + $0x18] sm:$0xff]   ;;  %v2889_v7 = vld [vmem:[%s3785_s2 + $0x20] sm:$0xff]   ;;  %v3195_v8 = vmov 1966171168   ;;  %vm126_vm1 = vcmask 1040384  }
  0x73   :  { %2598 = vmatprep.subr.mxu1 %v3193_v0  ;;  %2600 = vmatprep.mubr.msk.f32.mxu1 %vm3194_vm0, %v3193_v0  ;;  %v3371_v6 = vshrl.u32 %v168_v3, 7  ;;  %v166_v9 = vunpack.c.l.s4 %v3195_v8  ;;  %v2890_v10 = vld [vmem:[%s3785_s2 + $0x28] sm:$0xff]   ;;  %v144_v11 = vld [vmem:[%s3783_s0] sm:$0x1]  ;;  %v145_v12 = vld [vmem:[%s3783_s0 + $0x1] sm:$0x1] }
  0x74   :  { %2579 = vmatpush3.bf16.msra.mxu0 %v2885_v1  ;;  %v2891_v14 = vld [vmem:[%s3785_s2 + $0x30] sm:$0xff]   ;;  %v164_v15 = vcombine.low %v144_v11, %v145_v12  ;;  %v2892_v17 = vld [vmem:[%s3785_s2 + $0x38] sm:$0xff]   ;;  %vm127_vm2 = vsmask.f32 256  ;;  %v129_v20 = vld [vmem:[#allocation2] sm:$0x1] }
  0x75   :  { %2580 = vmatprep.subr.bf16.mxu0 %v3193_v0  ;;  %v167_v13 = vunpack.c.0.s8 %v166_v9  ;;  %vm135_vm3 = vcmask 1042434   ;;  %vm128_vm4 = vmand %vm126_vm1, %vm127_vm2  ;;  %v132_v21 = vld [vmem:[#allocation2 + $0x4] sm:$0x1]  ;;  %vm136_vm5 = vsmask.f32 7946  ;;  %vm280_vm7 = vcmask 1043456  }
  0x76   :  { %v138_v22 = vld [vmem:[#allocation2] sm:$0x4]  ;;  %v130_v23 = vsel %vm128_vm4, 0, %v129_v20  ;;  %v133_v24 = vsel %vm128_vm4, 0, %v132_v21  ;;  %vm137_vm6 = vmand %vm135_vm3, %vm136_vm5  ;;  %v141_v25 = vld [vmem:[#allocation2 + $0x4] sm:$0x4] }
  0x77   :  { %v170_v16 = vsub.s32 %v167_v13, %v3371_v6  ;;  %131 = vst [vmem:[#allocation2] sm:$0x1] %v130_v23  ;;  %134 = vst [vmem:[#allocation2 + $0x4] sm:$0x1] %v133_v24  ;;  %v139_v26 = vsel %vm137_vm6, 0, %v138_v22  ;;  %v142_v27 = vsel %vm137_vm6, 0, %v141_v25 }
  0x78   :  { %2581 = vmatpush3.bf16.msra.mxu0 %v2886_v2  ;;  %140 = vst [vmem:[#allocation2] sm:$0x4] %v139_v26  ;;  %143 = vst [vmem:[#allocation2 + $0x4] sm:$0x4] %v142_v27  ;;  %v268_v28 = vld [vmem:[%s3786_s3] sm:$0xff]  ;;  %vm276_vm8 = vcmask 31744  }
  0x79   :  { %2582 = vmatprep.subr.bf16.mxu0 %v3193_v0  ;;  %v171_v18 = vrot.slane %v164_v15, %v170_v16  ;;  %v2893_v29 = vld [vmem:[%s3788_s5 + $0x40] sm:$0xff]   ;;  %v2894_v34 = vld [vmem:[%s3788_s5 + $0x48] sm:$0xff]   ;;  %v2895_v37 = vld [vmem:[%s3788_s5 + $0x50] sm:$0xff]   ;;  %vm428_vm9 = vsmask.f32 1280  ;;  %vm697_vm4 = vcmask 1044484  }
  0x7a   :  { %v2264_v35 = vld.sshfl [vmem:[%s3784_s1] sm:$0x13 pattern:$0x76325410]  ;;  %vm429_vm10 = vsmask.f32 3336  ;;  %vm696_vm2 = vmor %vm126_vm1, %vm135_vm3 }
  0x7b   :  { %v178_v19 = vrot.slane %v171_v18, %v170_v16  ;;  %v2265_v36 = vld.sshfl [vmem:[%s3784_s1 + $0x4] sm:$0x13 pattern:$0x76325410]  ;;  %v436_v38 = vshrl.u32 %v2264_v35, 16  ;;  %v439_v39 = vshll.u32 %v2264_v35, 16  ;;  %v419_v42 = vcombine.high %v2264_v35, %v2264_v35  ;;  %vm430_vm11 = vmor %vm428_vm9, %vm429_vm10 }
  0x7c   :  { %2583 = vmatpush3.bf16.msra.mxu0 %v2887_v4  ;;  %v450_v40 = vshrl.u32 %v2265_v36, 16  ;;  %v453_v41 = vshll.u32 %v2265_v36, 16  ;;  %v427_v43 = vcombine.high %v2265_v36, %v2265_v36  ;;  %v2896_v44 = vld [vmem:[%s3788_s5 + $0x58] sm:$0xff]   ;;  %vm431_vm12 = vsmask.f32 5392  ;;  %v2897_v49 = vld [vmem:[%s3788_s5 + $0x60] sm:$0xff]   ;;  %vm698_vm5 = vmor %vm696_vm2, %vm697_vm4 }
  0x7d   :  { %2584 = vmatprep.subr.bf16.mxu0 %v3193_v0  ;;  %v438_v45 = vrot.slane %v436_v38, 6  ;;  %v441_v46 = vrot.slane %v439_v39, 7  ;;  %v445_v51 = vshll.u32 %v419_v42, 16  ;;  %vm432_vm13 = vmor %vm430_vm11, %vm431_vm12  ;;  %vm433_vm14 = vsmask.f32 7448  ;;  %v2898_v56 = vld [vmem:[%s3788_s5 + $0x68] sm:$0xff]  }
  0x7e   :  { %v452_v47 = vrot.slane %v450_v40, 6  ;;  %v455_v48 = vrot.slane %v453_v41, 7  ;;  %v459_v53 = vshll.u32 %v427_v43, 16  ;;  %v3196_v54 = vmov 1983009808   ;;  %vm3437_vm15 = vmor %vm432_vm13, %vm433_vm14  ;;  %v2899_v63 = vld [vmem:[%s3788_s5 + $0x70] sm:$0xff]  }
  0x7f   :  { %v442_v50 = vor.u32 %v441_v46, %v438_v45  ;;  %v482_v55 = vunpack.c.l.s4 %v3196_v54  ;;  %v447_v58 = vrot.slane %v445_v51, 7  ;;  %v2901_v8 = vld [vmem:[%s3788_s5] sm:$0xff]   ;;  %v2903_v9 = vld [vmem:[%s3788_s5 + $0x10] sm:$0xff]   ;;  %v2906_v12 = vld [vmem:[%s3788_s5 + $0x28] sm:$0xff]   ;;  %vm699_vm6 = vcmask 1046534  }
  0x80   :  { %2585 = vmatpush3.bf16.msra.mxu0 %v2888_v5  ;;  %v456_v52 = vor.u32 %v455_v48, %v452_v47  ;;  %v461_v60 = vrot.slane %v459_v53, 7  ;;  %v2900_v5 = vld [vmem:[%s3788_s5 + $0x78] sm:$0xff]   ;;  %v2905_v11 = vld [vmem:[%s3788_s5 + $0x20] sm:$0xff]   ;;  %v2907_v13 = vld [vmem:[%s3788_s5 + $0x30] sm:$0xff]   ;;  %vm381_vm1 = vcmask 1042432  }
  0x81   :  { %2586 = vmatprep.subr.bf16.mxu0 %v3193_v0  ;;  %v443_v57 = vrot.slane %v442_v50, 2  ;;  %v483_v62 = vunpack.c.0.s8 %v482_v55  ;;  %v2908_v15 = vld [vmem:[%s3788_s5 + $0x38] sm:$0xff]   ;;  %v2910_v16 = vld [vmem:[%s3788_s5 + $0x80] sm:$0xff]   ;;  %v2912_v18 = vld [vmem:[%s3788_s5 + $0x90] sm:$0xff]   ;;  %vm382_vm3 = vsmask.f32 2306 }
  0x82   :  { %v457_v59 = vrot.slane %v456_v52, 2  ;;  %v2298_v20 = vld.sshfl [vmem:[%s3784_s1] sm:$0x12 pattern:$0x76325410]  ;;  %v2915_v25 = vld [vmem:[%s3788_s5 + $0xa8] sm:$0xff]  }
  0x83   :  { %v448_v1 = vsel %vm3437_vm15, %v443_v57, %v447_v58  ;;  %v3450_v3 = vsub.s32 %v483_v62, %v3371_v6  ;;  %v2902_v6 = vld [vmem:[%s3788_s5 + $0x8] sm:$0xff]   ;;  %v2914_v21 = vld [vmem:[%s3788_s5 + $0xa0] sm:$0xff]   ;;  %v687_v23 = vcombine.high %v2298_v20, %v2298_v20  ;;  %v2300_v26 = vrot.slane %v2298_v20, 9  ;;  %v2917_v35 = vld [vmem:[%s3788_s5 + $0xb8] sm:$0xff]  }
  0x84   :  { %2587 = vmatpush3.bf16.msra.mxu0 %v2889_v7  ;;  %v462_v2 = vsel %vm3437_vm15, %v457_v59, %v461_v60  ;;  %v2299_v22 = vld.sshfl [vmem:[%s3784_s1 + $0x4] sm:$0x12 pattern:$0x76325410]  ;;  %v2919_v38 = vld [vmem:[#allocation3 + $0x48] sm:$0xff]   ;;  %v2920_v39 = vld [vmem:[#allocation3 + $0x50] sm:$0xff]  }
  0x85   :  { %2588 = vmatprep.subr.bf16.mxu0 %v3193_v0  ;;  %v480_v4 = vcombine.low %v448_v1, %v462_v2  ;;  %v695_v24 = vcombine.high %v2299_v22, %v2299_v22  ;;  %v703_v27 = vrot.slane %v687_v23, 7  ;;  %v2921_v40 = vld [vmem:[#allocation3 + $0x58] sm:$0xff]   ;;  %v2922_v41 = vld [vmem:[#allocation3 + $0x60] sm:$0xff]   ;;  %v2923_v42 = vld [vmem:[#allocation3 + $0x68] sm:$0xff]  }
  0x86   :  { %v2924_v43 = vld [vmem:[#allocation3 + $0x70] sm:$0xff]   ;;  %v2259_v45 = vld [vmem:[%s3787_s4] ss:$0 sm:$0xff]  ;;  %v387_v62 = vld [vmem:[#allocation2 + $0x4] sm:$0x7] }
  0x87   :  { %v487_v7 = vrot.slane %v480_v4, %v3450_v3  ;;  %v384_v57 = vld [vmem:[#allocation2] sm:$0x7]  ;;  %v2978_v61 = vld [vmem:[%s3795_s12 + $0x10] sm:$0xff]  }
  0x88   :  { %2589 = vmatpush3.bf16.msra.mxu0 %v2890_v10  ;;  %v2904_v10 = vld [vmem:[%s3788_s5 + $0x18] sm:$0xff]  }
  0x89   :  { %2590 = vmatprep.subr.bf16.mxu0 %v3193_v0 }
  0x8c   :  { %2591 = vmatpush3.bf16.msra.mxu0 %v2891_v14  ;;  %v2993_v14 = vld.sshfl [vmem:[%s3784_s1] sm:$0xf pattern:$0x76325410]  ;;  %s3197_s1 = smov [#allocation14]  }
  0x8d   :  { %2592 = vmatprep.subr.bf16.mxu0 %v3193_v0  ;;  %s2225_s21 = sshll.u32 %s3197_s1, 4  ;;  %s2226_s21 = int_to_ptr.vmem [resolvable:$true] %s2225_s21 }
  0x8e   :  { %s3129_s22 = scalar_lea.vmem %s2226_s21, 64  ;;  %p3134_p7 = scmp.lt.s32.totalorder %s2226_s21, %s2226_s21 }
  0x8f   :  { %p3130_p6 = scmp.ne.s32.totalorder %s2226_s21, %s3129_s22  ;;  %p3135_p8 = scmp.lt.s32.totalorder %s3129_s22, %s3129_s22 }
  0x90   :  { %2593 = vmatpush3.bf16.msra.mxu0 %v2892_v17  ;;  %v2911_v17 = vld [vmem:[%s3788_s5 + $0x88] sm:$0xff]  }
  0x91   :  { %2723 = vmatprep.subr.bf16.mxu0 %v3193_v0  ;;  %p3136_p9 = por %p3135_p8, %p3134_p7 }
  0x93   :  { %2595 = vmatmul.mubr.bf16.vlgmr.msra.gmra.mrb[0].mxu0 %v178_v19  ;;  %v2913_v19 = vld [vmem:[%s3788_s5 + $0x98] sm:$0xff]   ;;  %p3137_p10 = pnand %p3136_p9, %p3130_p6 }
  0x94   :  { %2739 = vmatprep.mubr.msk.bf16.mxu0 %vm3194_vm0, %v3193_v0 }
 0x166   :  { %v262_v30 = vpop.f32.mrb[0].mxu0 }
 0x167   :  { %v2596_v31 = vpop.f32.mrb[1].mxu0  ;;  %2599 = vmatpush3.msk.msra.mxu1 %vm280_vm7, %v262_v30  ;;  %vm3528_vm7 = vmor %vm698_vm5, %vm699_vm6 }
 0x168   :  { %v265_v32 = vpop.f32.mrb[2].mxu0  ;;  %2601 = vmatmul.mubr.msk.f32.vlgmr.msra.gmra.mrb[0].mxu1 %vm276_vm8, %v268_v28  ;;  %2603 = vmatprep.subr.bf16.mxu1 %v3193_v0  ;;  %v2301_v28 = vrot.slane %v2299_v22, 9  ;;  %v2916_v31 = vld [vmem:[%s3788_s5 + $0xb0] sm:$0xff]   ;;  %vm3559_vm8 = vmand %vm381_vm1, %vm382_vm3 }
 0x169   :  { %v2597_v33 = vpop.f32.mrb[3].mxu0  ;;  %2604 = vmatpush3.bf16.msra.mxu1 %v2893_v29  ;;  %2619 = vmatprep.mubr.msk.bf16.mxu1 %vm3194_vm0, %v3193_v0  ;;  %v707_v29 = vrot.slane %v695_v24, 7  ;;  %v704_v32 = vsel %vm3528_vm7, %v2300_v26, %v703_v27  ;;  %v2926_v27 = vld [vmem:[#allocation3] sm:$0xff]  }
 0x16a   :  { %2605 = vmatprep.subr.bf16.mxu1 %v3193_v0 }
 0x16b   :  { %v708_v33 = vsel %vm3528_vm7, %v2301_v28, %v707_v29  ;;  %v2927_v29 = vld [vmem:[#allocation3 + $0x8] sm:$0xff]  }
 0x16d   :  { %2606 = vmatpush3.bf16.msra.mxu1 %v2894_v34  ;;  %v726_v34 = vcombine.low %v704_v32, %v708_v33  ;;  %v2929_v32 = vld [vmem:[#allocation3 + $0x18] sm:$0xff]   ;;  %v2930_v33 = vld [vmem:[#allocation3 + $0x20] sm:$0xff]  }
 0x16e   :  { %2607 = vmatprep.subr.bf16.mxu1 %v3193_v0 }
 0x16f   :  { %v733_v36 = vrot.slane %v726_v34, %v3450_v3  ;;  %v2931_v34 = vld [vmem:[#allocation3 + $0x28] sm:$0xff]  }
 0x171   :  { %2608 = vmatpush3.bf16.msra.mxu1 %v2895_v37  ;;  %v2918_v37 = vld [vmem:[#allocation3 + $0x40] sm:$0xff]  }
 0x172   :  { %2609 = vmatprep.subr.bf16.mxu1 %v3193_v0 }
 0x175   :  { %2610 = vmatpush3.bf16.msra.mxu1 %v2896_v44  ;;  %v2925_v44 = vld [vmem:[#allocation3 + $0x78] sm:$0xff]  }
 0x176   :  { %2611 = vmatprep.subr.bf16.mxu1 %v3193_v0 }
 0x179   :  { %2612 = vmatpush3.bf16.msra.mxu1 %v2897_v49 }
 0x17a   :  { %2613 = vmatprep.subr.bf16.mxu1 %v3193_v0 }
 0x17d   :  { %2614 = vmatpush3.bf16.msra.mxu1 %v2898_v56 }
 0x17e   :  { %2615 = vmatprep.subr.bf16.mxu1 %v3193_v0 }
 0x181   :  { %2616 = vmatpush3.bf16.msra.mxu1 %v2899_v63 }
 0x182   :  { %2617 = vmatprep.subr.bf16.mxu1 %v3193_v0 }
 0x185   :  { %2618 = vmatpush3.bf16.msra.mxu1 %v2900_v5 }
 0x186   :  { %2623 = vmatprep.subr.bf16.mxu1 %v3193_v0 }
 0x188   :  { %2620 = vmatmul.mubr.bf16.vlgmr.msra.gmra.mrb[4].mxu1 %v487_v7 }
 0x189   :  { %2624 = vmatpush3.bf16.msra.mxu1 %v2901_v8  ;;  %2639 = vmatprep.mubr.msk.bf16.mxu1 %vm3194_vm0, %v3193_v0 }
 0x18a   :  { %2625 = vmatprep.subr.bf16.mxu1 %v3193_v0 }
 0x18d   :  { %2626 = vmatpush3.bf16.msra.mxu1 %v2902_v6 }
 0x18e   :  { %2627 = vmatprep.subr.bf16.mxu1 %v3193_v0 }
 0x191   :  { %2628 = vmatpush3.bf16.msra.mxu1 %v2903_v9 }
 0x192   :  { %2629 = vmatprep.subr.bf16.mxu1 %v3193_v0 }
 0x195   :  { %2630 = vmatpush3.bf16.msra.mxu1 %v2904_v10 }
 0x196   :  { %2631 = vmatprep.subr.bf16.mxu1 %v3193_v0 }
 0x199   :  { %2632 = vmatpush3.bf16.msra.mxu1 %v2905_v11 }
 0x19a   :  { %2633 = vmatprep.subr.bf16.mxu1 %v3193_v0 }
 0x19d   :  { %2634 = vmatpush3.bf16.msra.mxu1 %v2906_v12 }
 0x19e   :  { %2635 = vmatprep.subr.bf16.mxu1 %v3193_v0 }
 0x1a1   :  { %2636 = vmatpush3.bf16.msra.mxu1 %v2907_v13 }
 0x1a2   :  { %2637 = vmatprep.subr.bf16.mxu1 %v3193_v0 }
 0x1a5   :  { %2638 = vmatpush3.bf16.msra.mxu1 %v2908_v15 }
 0x1a6   :  { %2643 = vmatprep.subr.bf16.mxu1 %v3193_v0 }
 0x1a8   :  { %2640 = vmatmul.mubr.bf16.vlgmr.msra.gmra.mrb[4].mxu1 %v2993_v14 }
 0x1a9   :  { %2644 = vmatpush3.bf16.msra.mxu1 %v2910_v16  ;;  %2659 = vmatprep.mubr.msk.bf16.mxu1 %vm3194_vm0, %v3193_v0 }
 0x1aa   :  { %2645 = vmatprep.subr.bf16.mxu1 %v3193_v0 }
 0x1ad   :  { %2646 = vmatpush3.bf16.msra.mxu1 %v2911_v17 }
 0x1ae   :  { %2647 = vmatprep.subr.bf16.mxu1 %v3193_v0 }
 0x1b1   :  { %2648 = vmatpush3.bf16.msra.mxu1 %v2912_v18 }
 0x1b2   :  { %2649 = vmatprep.subr.bf16.mxu1 %v3193_v0 }
 0x1b5   :  { %2650 = vmatpush3.bf16.msra.mxu1 %v2913_v19 }
 0x1b6   :  { %2651 = vmatprep.subr.bf16.mxu1 %v3193_v0 }
 0x1b9   :  { %2652 = vmatpush3.bf16.msra.mxu1 %v2914_v21 }
 0x1ba   :  { %2653 = vmatprep.subr.bf16.mxu1 %v3193_v0 }
 0x1bd   :  { %2654 = vmatpush3.bf16.msra.mxu1 %v2915_v25 }
 0x1be   :  { %2655 = vmatprep.subr.bf16.mxu1 %v3193_v0 }
 0x1c1   :  { %2656 = vmatpush3.bf16.msra.mxu1 %v2916_v31  ;;  %v2928_v31 = vld [vmem:[#allocation3 + $0x10] sm:$0xff]  }
 0x1c2   :  { %2657 = vmatprep.subr.bf16.mxu1 %v3193_v0 }
 0x1c5   :  { %2658 = vmatpush3.bf16.msra.mxu1 %v2917_v35  ;;  %v2932_v35 = vld [vmem:[#allocation3 + $0x30] sm:$0xff]  }
 0x1c6   :  { %2663 = vmatprep.subr.bf16.mxu1 %v3193_v0 }
 0x1c8   :  { %2660 = vmatmul.mubr.bf16.vlgmr.msra.gmra.mrb[4].mxu1 %v733_v36  ;;  %v2933_v36 = vld [vmem:[#allocation3 + $0x38] sm:$0xff]  }
 0x1c9   :  { %2664 = vmatpush3.bf16.msra.mxu1 %v2918_v37  ;;  %2679 = vmatprep.mubr.msk.bf16.mxu1 %vm3194_vm0, %v3193_v0 }
 0x1ca   :  { %2665 = vmatprep.subr.bf16.mxu1 %v3193_v0 }
 0x1cd   :  { %2666 = vmatpush3.bf16.msra.mxu1 %v2919_v38  ;;  %v2935_v38 = vld [vmem:[#allocation3 + $0x80] sm:$0xff]  }
 0x1ce   :  { %2667 = vmatprep.subr.bf16.mxu1 %v3193_v0 }
 0x1d1   :  { %2668 = vmatpush3.bf16.msra.mxu1 %v2920_v39  ;;  %v2936_v39 = vld [vmem:[#allocation3 + $0x88] sm:$0xff]  }
 0x1d2   :  { %2669 = vmatprep.subr.bf16.mxu1 %v3193_v0 }
 0x1d5   :  { %2670 = vmatpush3.bf16.msra.mxu1 %v2921_v40  ;;  %v2937_v40 = vld [vmem:[#allocation3 + $0x90] sm:$0xff]  }
 0x1d6   :  { %2671 = vmatprep.subr.bf16.mxu1 %v3193_v0 }
 0x1d9   :  { %2672 = vmatpush3.bf16.msra.mxu1 %v2922_v41  ;;  %v2938_v41 = vld [vmem:[#allocation3 + $0x98] sm:$0xff]  }
 0x1da   :  { %2673 = vmatprep.subr.bf16.mxu1 %v3193_v0 }
 0x1dd   :  { %2674 = vmatpush3.bf16.msra.mxu1 %v2923_v42 }
 0x1de   :  { %2675 = vmatprep.subr.bf16.mxu1 %v3193_v0 }
 0x1e1   :  { %2676 = vmatpush3.bf16.msra.mxu1 %v2924_v43  ;;  %v2939_v43 = vld [vmem:[#allocation3 + $0xa0] sm:$0xff]  }
 0x1e2   :  { %2677 = vmatprep.subr.bf16.mxu1 %v3193_v0 }
 0x1e5   :  { %2678 = vmatpush3.bf16.msra.mxu1 %v2925_v44 }
 0x1e6   :  { %2683 = vmatprep.subr.bf16.mxu1 %v3193_v0 }
 0x23b   :  { %v350_v46 = vpop.f32.mrb[0].mxu1 }
 0x23c   :  { %v351_v47 = vadd.f32 %v2259_v45, %v350_v46  ;;  %v2602_v48 = vpop.f32.mrb[1].mxu1  ;;  %v2940_v46 = vld [vmem:[#allocation3 + $0xa8] sm:$0xff]  }
 0x23e   :  { %v355_v49 = vcombine.high %v351_v47, %v351_v47  ;;  %v2455_v50 = vpack.c.bf16 %v351_v47, %v351_v47 }
 0x240   :  { %v2456_v51 = vpack.c.bf16 %v355_v49, %v355_v49  ;;  %v366_v52 = vshrl.u32 %v2455_v50, 16  ;;  %v369_v54 = vshll.u32 %v2455_v50, 16  ;;  %v2941_v49 = vld [vmem:[#allocation3 + $0xb0] sm:$0xff]  }
 0x242   :  { %v368_v53 = vrot.slane %v366_v52, 7  ;;  %v373_v55 = vshrl.u32 %v2456_v51, 16  ;;  %v376_v60 = vshll.u32 %v2456_v51, 16 }
 0x244   :  { %v371_v58 = vor.u32 %v369_v54, %v368_v53  ;;  %v375_v59 = vrot.slane %v373_v55, 7  ;;  %v2942_v54 = vld [vmem:[#allocation3 + $0xb8] sm:$0xff]  }
 0x246   :  { %v378_v63 = vor.u32 %v376_v60, %v375_v59  ;;  %v385_v1 = vsel %vm3559_vm8, %v371_v58, %v384_v57  ;;  %v2943_v59 = vld [vmem:[#allocation9 + $0x40] sm:$0xff]   ;;  %v2944_v60 = vld [vmem:[#allocation9 + $0x48] sm:$0xff]  }
 0x247   :  { %386 = vst [vmem:[#allocation2] sm:$0x7] %v385_v1  ;;  %2724 = vmatpush3.bf16.msra.mxu0 %v2943_v59  ;;  %v2947_v1 = vld [vmem:[#allocation9 + $0x60] sm:$0xff]   ;;  %v2953_v59 = vld [vmem:[#allocation9 + $0x10] sm:$0xff]  }
 0x248   :  { %v388_v2 = vsel %vm3559_vm8, %v378_v63, %v387_v62  ;;  %2725 = vmatprep.subr.bf16.mxu0 %v3193_v0  ;;  %v2945_v62 = vld [vmem:[#allocation9 + $0x50] sm:$0xff]   ;;  %v2946_v63 = vld [vmem:[#allocation9 + $0x58] sm:$0xff]  }
 0x249   :  { %389 = vst [vmem:[#allocation2 + $0x4] sm:$0x7] %v388_v2  ;;  %v2948_v2 = vld [vmem:[#allocation9 + $0x68] sm:$0xff]  }
 0x24b   :  { %2726 = vmatpush3.bf16.msra.mxu0 %v2944_v60  ;;  %v2954_v60 = vld [vmem:[#allocation9 + $0x18] sm:$0xff]  }
 0x24c   :  { %2727 = vmatprep.subr.bf16.mxu0 %v3193_v0 }
 0x24e   :  { %v2326_v4 = vld.sshfl [vmem:[#allocation2] sm:$0x13 pattern:$0x76325410] }
 0x24f   :  { %v863_v5 = vshrl.u32 %v2326_v4, 16  ;;  %v866_v7 = vshll.u32 %v2326_v4, 16  ;;  %v853_v6 = vcombine.high %v2326_v4, %v2326_v4  ;;  %v2344_v44 = vld.sshfl [vmem:[#allocation2] sm:$0x12 pattern:$0x76325410]  ;;  %2728 = vmatpush3.bf16.msra.mxu0 %v2945_v62 }
 0x250   :  { %v2327_v8 = vld.sshfl [vmem:[#allocation2 + $0x4] sm:$0x13 pattern:$0x76325410]  ;;  %v1114_v47 = vcombine.high %v2344_v44, %v2344_v44  ;;  %v2346_v52 = vrot.slane %v2344_v44, 9  ;;  %2729 = vmatprep.subr.bf16.mxu0 %v3193_v0  ;;  %v2949_v4 = vld [vmem:[#allocation9 + $0x70] sm:$0xff]  }
 0x251   :  { %v861_v9 = vcombine.high %v2327_v8, %v2327_v8  ;;  %v865_v10 = vrot.slane %v863_v5, 6  ;;  %v868_v11 = vrot.slane %v866_v7, 7  ;;  %v877_v12 = vshrl.u32 %v2327_v8, 16  ;;  %v2950_v5 = vld [vmem:[#allocation9 + $0x78] sm:$0xff]   ;;  %v2955_v62 = vld [vmem:[#allocation9 + $0x20] sm:$0xff]  }
 0x252   :  { %v880_v13 = vshll.u32 %v2327_v8, 16  ;;  %v872_v15 = vshll.u32 %v853_v6, 16  ;;  %v2994_v37 = vld.sshfl [vmem:[#allocation2] sm:$0xf pattern:$0x76325410] }
 0x253   :  { %v869_v14 = vor.u32 %v868_v11, %v865_v10  ;;  %v879_v16 = vrot.slane %v877_v12, 6  ;;  %v886_v18 = vshll.u32 %v861_v9, 16  ;;  %v2345_v42 = vld.sshfl [vmem:[#allocation2 + $0x4] sm:$0x12 pattern:$0x76325410]  ;;  %2730 = vmatpush3.bf16.msra.mxu0 %v2946_v63 }
 0x254   :  { %v882_v17 = vrot.slane %v880_v13, 7  ;;  %v874_v21 = vrot.slane %v872_v15, 7  ;;  %v1122_v45 = vcombine.high %v2345_v42, %v2345_v42  ;;  %v1125_v50 = vrot.slane %v1114_v47, 7  ;;  %2731 = vmatprep.subr.bf16.mxu0 %v3193_v0  ;;  %v2356_v7 = vld [vmem:[#allocation6] ss:$0 sm:$0xff]  ;;  %v2956_v63 = vld [vmem:[#allocation9 + $0x28] sm:$0xff]  }
 0x255   :  { %v870_v19 = vrot.slane %v869_v14, 2  ;;  %v888_v23 = vrot.slane %v886_v18, 7  ;;  %v2347_v51 = vrot.slane %v2345_v42, 9  ;;  %v2357_v6 = vld [vmem:[#allocation8] ss:$0 sm:$0xff] }
 0x256   :  { %v883_v20 = vor.u32 %v882_v17, %v879_v16  ;;  %v1129_v48 = vrot.slane %v1122_v45, 7  ;;  %v1126_v55 = vsel %vm3528_vm7, %v2346_v52, %v1125_v50 }
 0x257   :  { %v875_v24 = vsel %vm3437_vm15, %v870_v19, %v874_v21  ;;  %2732 = vmatpush3.bf16.msra.mxu0 %v2947_v1  ;;  %v2957_v1 = vld [vmem:[#allocation9 + $0x30] sm:$0xff]  }
 0x258   :  { %v884_v22 = vrot.slane %v883_v20, 2  ;;  %v1130_v53 = vsel %vm3528_vm7, %v2347_v51, %v1129_v48  ;;  %2733 = vmatprep.subr.bf16.mxu0 %v3193_v0 }
 0x259   :  { %v1148_v57 = vcombine.low %v1126_v55, %v1130_v53  ;;  %v2951_v55 = vld [vmem:[#allocation9] sm:$0xff]  }
 0x25a   :  { %v889_v25 = vsel %vm3437_vm15, %v884_v22, %v888_v23 }
 0x25b   :  { %v907_v26 = vcombine.low %v875_v24, %v889_v25  ;;  %v1155_v58 = vrot.slane %v1148_v57, %v3450_v3  ;;  %2734 = vmatpush3.bf16.msra.mxu0 %v2948_v2  ;;  %v2958_v2 = vld [vmem:[#allocation9 + $0x38] sm:$0xff]  }
 0x25c   :  { %2735 = vmatprep.subr.bf16.mxu0 %v3193_v0 }
 0x25d   :  { %v914_v28 = vrot.slane %v907_v26, %v3450_v3  ;;  %v1293_v26 = vld [vmem:[#allocation2] sm:$0x7] }
 0x25f   :  { %2680 = vmatmul.mubr.bf16.vlgmr.msra.gmra.mrb[4].mxu1 %v914_v28  ;;  %2736 = vmatpush3.bf16.msra.mxu0 %v2949_v4 }
 0x260   :  { %2684 = vmatpush3.bf16.msra.mxu1 %v2926_v27  ;;  %2699 = vmatprep.mubr.msk.bf16.mxu1 %vm3194_vm0, %v3193_v0 }
 0x261   :  { %2685 = vmatprep.subr.bf16.mxu1 %v3193_v0  ;;  %2737 = vmatprep.subr.bf16.mxu0 %v3193_v0 }
 0x263   :  { %2738 = vmatpush3.bf16.msra.mxu0 %v2950_v5  ;;  %v2960_v5 = vld [vmem:[#allocation9 + $0x80] sm:$0xff]  }
 0x264   :  { %2686 = vmatpush3.bf16.msra.mxu1 %v2927_v29  ;;  %2743 = vmatprep.subr.bf16.mxu0 %v3193_v0  ;;  %v1296_v29 = vld [vmem:[#allocation2 + $0x4] sm:$0x7] }
 0x265   :  { %2687 = vmatprep.subr.bf16.mxu1 %v3193_v0 }
 0x268   :  { %2688 = vmatpush3.bf16.msra.mxu1 %v2928_v31 }
 0x269   :  { %2689 = vmatprep.subr.bf16.mxu1 %v3193_v0 }
 0x26c   :  { %2690 = vmatpush3.bf16.msra.mxu1 %v2929_v32 }
 0x26d   :  { %2691 = vmatprep.subr.bf16.mxu1 %v3193_v0 }
 0x270   :  { %2692 = vmatpush3.bf16.msra.mxu1 %v2930_v33 }
 0x271   :  { %2693 = vmatprep.subr.bf16.mxu1 %v3193_v0 }
 0x274   :  { %2694 = vmatpush3.bf16.msra.mxu1 %v2931_v34 }
 0x275   :  { %2695 = vmatprep.subr.bf16.mxu1 %v3193_v0 }
 0x278   :  { %2696 = vmatpush3.bf16.msra.mxu1 %v2932_v35 }
 0x279   :  { %2697 = vmatprep.subr.bf16.mxu1 %v3193_v0 }
 0x27c   :  { %2698 = vmatpush3.bf16.msra.mxu1 %v2933_v36 }
 0x27d   :  { %2703 = vmatprep.subr.bf16.mxu1 %v3193_v0 }
 0x27f   :  { %2700 = vmatmul.mubr.bf16.vlgmr.msra.gmra.mrb[4].mxu1 %v2994_v37 }
 0x280   :  { %2704 = vmatpush3.bf16.msra.mxu1 %v2935_v38  ;;  %2719 = vmatprep.mubr.msk.bf16.mxu1 %vm3194_vm0, %v3193_v0 }
 0x281   :  { %2705 = vmatprep.subr.bf16.mxu1 %v3193_v0 }
 0x284   :  { %2706 = vmatpush3.bf16.msra.mxu1 %v2936_v39 }
 0x285   :  { %2707 = vmatprep.subr.bf16.mxu1 %v3193_v0 }
 0x288   :  { %2708 = vmatpush3.bf16.msra.mxu1 %v2937_v40 }
 0x289   :  { %2709 = vmatprep.subr.bf16.mxu1 %v3193_v0 }
 0x28c   :  { %2710 = vmatpush3.bf16.msra.mxu1 %v2938_v41 }
 0x28d   :  { %2711 = vmatprep.subr.bf16.mxu1 %v3193_v0 }
 0x290   :  { %2712 = vmatpush3.bf16.msra.mxu1 %v2939_v43 }
 0x291   :  { %2713 = vmatprep.subr.bf16.mxu1 %v3193_v0 }
 0x294   :  { %2714 = vmatpush3.bf16.msra.mxu1 %v2940_v46 }
 0x295   :  { %2715 = vmatprep.subr.bf16.mxu1 %v3193_v0 }
 0x298   :  { %2716 = vmatpush3.bf16.msra.mxu1 %v2941_v49 }
 0x299   :  { %2717 = vmatprep.subr.bf16.mxu1 %v3193_v0 }
 0x29c   :  { %2718 = vmatpush3.bf16.msra.mxu1 %v2942_v54 }
 0x29f   :  { %2720 = vmatmul.mubr.bf16.vlgmr.msra.gmra.mrb[4].mxu1 %v1155_v58  ;;  %v2952_v58 = vld [vmem:[#allocation9 + $0x8] sm:$0xff]  }
 0x372   :  { %v1239_v8 = vpop.f32.mrb[4].mxu1 }
 0x373   :  { %v1254_v9 = vmul.f32 %v2356_v7, %v1239_v8  ;;  %v2721_v10 = vpop.f32.mrb[5].mxu1  ;;  %v2961_v7 = vld [vmem:[#allocation9 + $0x88] sm:$0xff]   ;;  %v2962_v8 = vld [vmem:[#allocation9 + $0x90] sm:$0xff]  }
 0x374   :  { %v1242_v11 = vpop.f32.mrb[6].mxu1  ;;  %v2964_v10 = vld [vmem:[#allocation9 + $0xa0] sm:$0xff]  }
 0x375   :  { %v1262_v12 = vadd.f32 %v2357_v6, %v1254_v9  ;;  %v2722_v13 = vpop.f32.mrb[7].mxu1  ;;  %v2963_v6 = vld [vmem:[#allocation9 + $0x98] sm:$0xff]  }
 0x376   :  { %v2965_v13 = vld [vmem:[#allocation9 + $0xa8] sm:$0xff]  }
 0x377   :  { %vm1263_vm9 = vcmp.gt.f32.partialorder %v1262_v12, 0.0  ;;  %v1264_v14 = vmul.f32 0.01, %v1262_v12 }
 0x379   :  { %v1265_v15 = vsel %vm1263_vm9, %v1262_v12, %v1264_v14 }
 0x37a   :  { %v1267_v16 = vcombine.high %v1265_v15, %v1265_v15  ;;  %v2457_v17 = vpack.c.bf16 %v1265_v15, %v1265_v15 }
 0x37c   :  { %v2458_v18 = vpack.c.bf16 %v1267_v16, %v1267_v16  ;;  %v1278_v19 = vshrl.u32 %v2457_v17, 16  ;;  %v1281_v21 = vshll.u32 %v2457_v17, 16  ;;  %v2966_v16 = vld [vmem:[#allocation9 + $0xb0] sm:$0xff]  }
 0x37e   :  { %v1280_v20 = vrot.slane %v1278_v19, 7  ;;  %v1285_v22 = vshrl.u32 %v2458_v18, 16  ;;  %v1288_v25 = vshll.u32 %v2458_v18, 16 }
 0x380   :  { %v1283_v23 = vor.u32 %v1281_v21, %v1280_v20  ;;  %v1287_v24 = vrot.slane %v1285_v22, 7  ;;  %v2967_v21 = vld [vmem:[#allocation9 + $0xb8] sm:$0xff]  }
 0x382   :  { %v1290_v27 = vor.u32 %v1288_v25, %v1287_v24  ;;  %v1294_v28 = vsel %vm3559_vm8, %v1283_v23, %v1293_v26  ;;  %v2968_v25 = vld [vmem:[%s3795_s12 + $0x40] sm:$0xff]   ;;  %v2969_v26 = vld [vmem:[%s3795_s12 + $0x48] sm:$0xff]  }
 0x383   :  { %1295 = vst [vmem:[#allocation2] sm:$0x7] %v1294_v28  ;;  %v2971_v28 = vld [vmem:[%s3795_s12 + $0x58] sm:$0xff]  }
 0x384   :  { %v1297_v31 = vsel %vm3559_vm8, %v1290_v27, %v1296_v29  ;;  %v2970_v27 = vld [vmem:[%s3795_s12 + $0x50] sm:$0xff]   ;;  %v2972_v29 = vld [vmem:[%s3795_s12 + $0x60] sm:$0xff]  }
 0x385   :  { %1298 = vst [vmem:[#allocation2 + $0x4] sm:$0x7] %v1297_v31  ;;  %v2973_v31 = vld [vmem:[%s3795_s12 + $0x68] sm:$0xff]  }
 0x38a   :  { %v2360_v32 = vld.sshfl [vmem:[#allocation2] sm:$0x13 pattern:$0x76325410] }
 0x38b   :  { %v1338_v33 = vshrl.u32 %v2360_v32, 16  ;;  %v1341_v34 = vshll.u32 %v2360_v32, 16  ;;  %v1328_v36 = vcombine.high %v2360_v32, %v2360_v32  ;;  %v2378_v11 = vld.sshfl [vmem:[#allocation2] sm:$0x12 pattern:$0x76325410] }
 0x38c   :  { %v2361_v35 = vld.sshfl [vmem:[#allocation2 + $0x4] sm:$0x13 pattern:$0x76325410]  ;;  %v1589_v14 = vcombine.high %v2378_v11, %v2378_v11  ;;  %v2380_v19 = vrot.slane %v2378_v11, 9  ;;  %v2974_v32 = vld [vmem:[%s3795_s12 + $0x70] sm:$0xff]  }
 0x38d   :  { %v1336_v37 = vcombine.high %v2361_v35, %v2361_v35  ;;  %v1340_v38 = vrot.slane %v1338_v33, 6  ;;  %v1343_v39 = vrot.slane %v1341_v34, 7  ;;  %v1352_v40 = vshrl.u32 %v2361_v35, 16  ;;  %v2975_v33 = vld [vmem:[%s3795_s12 + $0x78] sm:$0xff]   ;;  %v2390_v34 = vld [vmem:[#allocation11] ss:$0 sm:$0xff] }
 0x38e   :  { %v1355_v41 = vshll.u32 %v2361_v35, 16  ;;  %v1347_v43 = vshll.u32 %v1328_v36, 16  ;;  %v2995_v4 = vld.sshfl [vmem:[#allocation2] sm:$0xf pattern:$0x76325410] }
 0x38f   :  { %v1344_v42 = vor.u32 %v1343_v39, %v1340_v38  ;;  %v1354_v44 = vrot.slane %v1352_v40, 6  ;;  %v1361_v46 = vshll.u32 %v1336_v37, 16  ;;  %v2379_v9 = vld.sshfl [vmem:[#allocation2 + $0x4] sm:$0x12 pattern:$0x76325410] }
 0x390   :  { %v1357_v45 = vrot.slane %v1355_v41, 7  ;;  %v1349_v49 = vrot.slane %v1347_v43, 7  ;;  %v1597_v12 = vcombine.high %v2379_v9, %v2379_v9  ;;  %v1600_v17 = vrot.slane %v1589_v14, 7  ;;  %v2391_v36 = vld [vmem:[#allocation12] ss:$0 sm:$0xff] }
 0x391   :  { %v1345_v47 = vrot.slane %v1344_v42, 2  ;;  %v1363_v51 = vrot.slane %v1361_v46, 7  ;;  %v2381_v18 = vrot.slane %v2379_v9, 9 }
 0x392   :  { %v1358_v48 = vor.u32 %v1357_v45, %v1354_v44  ;;  %v1604_v15 = vrot.slane %v1597_v12, 7  ;;  %v1601_v22 = vsel %vm3528_vm7, %v2380_v19, %v1600_v17 }
 0x393   :  { %v1350_v52 = vsel %vm3437_vm15, %v1345_v47, %v1349_v49 }
 0x394   :  { %v1359_v50 = vrot.slane %v1358_v48, 2  ;;  %v1605_v20 = vsel %vm3528_vm7, %v2381_v18, %v1604_v15 }
 0x395   :  { %v1623_v23 = vcombine.low %v1601_v22, %v1605_v20 }
 0x396   :  { %v1364_v53 = vsel %vm3437_vm15, %v1359_v50, %v1363_v51 }
 0x397   :  { %v1382_v54 = vcombine.low %v1350_v52, %v1364_v53  ;;  %v1630_v24 = vrot.slane %v1623_v23, %v3450_v3  ;;  %v2976_v23 = vld [vmem:[%s3795_s12] sm:$0xff]  }
 0x399   :  { %v1389_v57 = vrot.slane %v1382_v54, %v3450_v3 }
 0x39b   :  { %2740 = vmatmul.mubr.bf16.vlgmr.msra.gmra.mrb[4].mxu0 %v1389_v57  ;;  %v1781_v57 = vld [vmem:[#allocation2] sm:$0x7] }
 0x39c   :  { %2744 = vmatpush3.bf16.msra.mxu0 %v2951_v55  ;;  %2759 = vmatprep.mubr.msk.bf16.mxu0 %vm3194_vm0, %v3193_v0 }
 0x39d   :  { %2745 = vmatprep.subr.bf16.mxu0 %v3193_v0 }
 0x3a0   :  { %2746 = vmatpush3.bf16.msra.mxu0 %v2952_v58 }
 0x3a1   :  { %2747 = vmatprep.subr.bf16.mxu0 %v3193_v0 }
 0x3a4   :  { %2748 = vmatpush3.bf16.msra.mxu0 %v2953_v59 }
 0x3a5   :  { %2749 = vmatprep.subr.bf16.mxu0 %v3193_v0 }
 0x3a8   :  { %2750 = vmatpush3.bf16.msra.mxu0 %v2954_v60  ;;  %v1784_v60 = vld [vmem:[#allocation2 + $0x4] sm:$0x7] }
 0x3a9   :  { %2751 = vmatprep.subr.bf16.mxu0 %v3193_v0 }
 0x3ac   :  { %2752 = vmatpush3.bf16.msra.mxu0 %v2955_v62 }
 0x3ad   :  { %2753 = vmatprep.subr.bf16.mxu0 %v3193_v0 }
 0x3b0   :  { %2754 = vmatpush3.bf16.msra.mxu0 %v2956_v63 }
 0x3b1   :  { %2755 = vmatprep.subr.bf16.mxu0 %v3193_v0 }
 0x3b4   :  { %2756 = vmatpush3.bf16.msra.mxu0 %v2957_v1 }
 0x3b5   :  { %2757 = vmatprep.subr.bf16.mxu0 %v3193_v0 }
 0x3b8   :  { %2758 = vmatpush3.bf16.msra.mxu0 %v2958_v2 }
 0x3b9   :  { %2763 = vmatprep.subr.bf16.mxu0 %v3193_v0 }
 0x3bb   :  { %2760 = vmatmul.mubr.bf16.vlgmr.msra.gmra.mrb[4].mxu0 %v2995_v4 }
 0x3bc   :  { %2764 = vmatpush3.bf16.msra.mxu0 %v2960_v5  ;;  %2779 = vmatprep.mubr.msk.bf16.mxu0 %vm3194_vm0, %v3193_v0 }
 0x3bd   :  { %2765 = vmatprep.subr.bf16.mxu0 %v3193_v0 }
 0x3c0   :  { %2766 = vmatpush3.bf16.msra.mxu0 %v2961_v7 }
 0x3c1   :  { %2767 = vmatprep.subr.bf16.mxu0 %v3193_v0 }
 0x3c4   :  { %2768 = vmatpush3.bf16.msra.mxu0 %v2962_v8 }
 0x3c5   :  { %2769 = vmatprep.subr.bf16.mxu0 %v3193_v0 }
 0x3c8   :  { %2770 = vmatpush3.bf16.msra.mxu0 %v2963_v6 }
 0x3c9   :  { %2771 = vmatprep.subr.bf16.mxu0 %v3193_v0 }
 0x3cc   :  { %2772 = vmatpush3.bf16.msra.mxu0 %v2964_v10 }
 0x3cd   :  { %2773 = vmatprep.subr.bf16.mxu0 %v3193_v0 }
 0x3d0   :  { %2774 = vmatpush3.bf16.msra.mxu0 %v2965_v13 }
 0x3d1   :  { %2775 = vmatprep.subr.bf16.mxu0 %v3193_v0 }
 0x3d4   :  { %2776 = vmatpush3.bf16.msra.mxu0 %v2966_v16 }
 0x3d5   :  { %2777 = vmatprep.subr.bf16.mxu0 %v3193_v0 }
 0x3d8   :  { %2778 = vmatpush3.bf16.msra.mxu0 %v2967_v21 }
 0x3d9   :  { %2783 = vmatprep.subr.bf16.mxu0 %v3193_v0 }
 0x3db   :  { %2780 = vmatmul.mubr.bf16.vlgmr.msra.gmra.mrb[4].mxu0 %v1630_v24 }
 0x3dc   :  { %2799 = vmatprep.mubr.msk.bf16.mxu0 %vm3194_vm0, %v3193_v0  ;;  %2784 = vmatpush3.bf16.msra.mxu0 %v2968_v25  ;;  %v2977_v25 = vld [vmem:[%s3795_s12 + $0x8] sm:$0xff]  }
 0x3dd   :  { %2785 = vmatprep.subr.bf16.mxu0 %v3193_v0 }
 0x3e0   :  { %2786 = vmatpush3.bf16.msra.mxu0 %v2969_v26  ;;  %v2979_v26 = vld [vmem:[%s3795_s12 + $0x18] sm:$0xff]  }
 0x3e1   :  { %2787 = vmatprep.subr.bf16.mxu0 %v3193_v0 }
 0x3e4   :  { %2788 = vmatpush3.bf16.msra.mxu0 %v2970_v27  ;;  %v2980_v27 = vld [vmem:[%s3795_s12 + $0x20] sm:$0xff]  }
 0x3e5   :  { %2789 = vmatprep.subr.bf16.mxu0 %v3193_v0 }
 0x3e8   :  { %2790 = vmatpush3.bf16.msra.mxu0 %v2971_v28  ;;  %v2981_v28 = vld [vmem:[%s3795_s12 + $0x28] sm:$0xff]  }
 0x3e9   :  { %2791 = vmatprep.subr.bf16.mxu0 %v3193_v0 }
 0x3ec   :  { %2792 = vmatpush3.bf16.msra.mxu0 %v2972_v29  ;;  %v2982_v29 = vld [vmem:[%s3795_s12 + $0x30] sm:$0xff]  }
 0x3ed   :  { %2793 = vmatprep.subr.bf16.mxu0 %v3193_v0 }
 0x3f0   :  { %2794 = vmatpush3.bf16.msra.mxu0 %v2973_v31  ;;  %v2983_v31 = vld [vmem:[%s3795_s12 + $0x38] sm:$0xff]  }
 0x3f1   :  { %2795 = vmatprep.subr.bf16.mxu0 %v3193_v0 }
 0x3f4   :  { %2796 = vmatpush3.bf16.msra.mxu0 %v2974_v32 }
 0x3f5   :  { %2797 = vmatprep.subr.bf16.mxu0 %v3193_v0 }
 0x3f8   :  { %2798 = vmatpush3.bf16.msra.mxu0 %v2975_v33  ;;  %v2985_v33 = vld [vmem:[%s3795_s12 + $0x80] sm:$0xff]  }
 0x3f9   :  { %2803 = vmatprep.subr.bf16.mxu0 %v3193_v0 }
 0x4ae   :  { %v1714_v35 = vpop.f32.mrb[4].mxu0 }
 0x4af   :  { %v1728_v37 = vmul.f32 %v2390_v34, %v1714_v35  ;;  %v2781_v38 = vpop.f32.mrb[5].mxu0  ;;  %v2986_v34 = vld [vmem:[%s3795_s12 + $0x88] sm:$0xff]   ;;  %v2987_v35 = vld [vmem:[%s3795_s12 + $0x90] sm:$0xff]  }
 0x4b0   :  { %v1717_v39 = vpop.f32.mrb[6].mxu0  ;;  %v2989_v38 = vld [vmem:[%s3795_s12 + $0xa0] sm:$0xff]  }
 0x4b1   :  { %v1736_v40 = vadd.f32 %v2391_v36, %v1728_v37  ;;  %v2782_v41 = vpop.f32.mrb[7].mxu0  ;;  %v2988_v36 = vld [vmem:[%s3795_s12 + $0x98] sm:$0xff]  }
 0x4b2   :  { %v2990_v41 = vld [vmem:[%s3795_s12 + $0xa8] sm:$0xff]  }
 0x4b3   :  { %vm1737_vm10 = vcmp.gt.f32.partialorder %v1736_v40, 0.0  ;;  %v1738_v42 = vmul.f32 0.01, %v1736_v40 }
 0x4b5   :  { %v1739_v43 = vsel %vm1737_vm10, %v1736_v40, %v1738_v42 }
 0x4b6   :  { %v1740_v44 = vpack.c.bf16 %v1739_v43, %v1739_v43 }
 0x4b8   :  { %v1749_v45 = vrot.slane %v1740_v44, %v3450_v3  ;;  %1741 = vst [vmem:[#allocation14] sm:$0xf] %v1740_v44  ;;  %v2991_v44 = vld [vmem:[%s3795_s12 + $0xb0] sm:$0xff]  }
 0x4ba   :  { %v1750_v46 = vcombine.high %v1749_v45, %v1749_v45  ;;  %v1757_v47 = vrot.slane %v1749_v45, %v3450_v3 }
 0x4bc   :  { %v1764_v48 = vrot.slane %v1750_v46, %v3450_v3  ;;  %v1766_v49 = vshrl.u32 %v1757_v47, 16  ;;  %v1769_v51 = vshll.u32 %v1757_v47, 16 }
 0x4be   :  { %v1768_v50 = vrot.slane %v1766_v49, 7  ;;  %v1773_v52 = vshrl.u32 %v1764_v48, 16  ;;  %v1776_v55 = vshll.u32 %v1764_v48, 16  ;;  %v2992_v49 = vld [vmem:[%s3795_s12 + $0xb8] sm:$0xff]  }
 0x4c0   :  { %v1771_v53 = vor.u32 %v1769_v51, %v1768_v50  ;;  %v1775_v54 = vrot.slane %v1773_v52, 7 }
 0x4c2   :  { %v1778_v58 = vor.u32 %v1776_v55, %v1775_v54  ;;  %v1782_v59 = vsel %vm3559_vm8, %v1771_v53, %v1781_v57 }
 0x4c3   :  { %1783 = vst [vmem:[#allocation2] sm:$0x7] %v1782_v59 }
 0x4c4   :  { %v1785_v62 = vsel %vm3559_vm8, %v1778_v58, %v1784_v60 }
 0x4c5   :  { %1786 = vst [vmem:[#allocation2 + $0x4] sm:$0x7] %v1785_v62 }
 0x4ca   :  { %v2392_v63 = vld.sshfl [vmem:[#allocation2] sm:$0x13 pattern:$0x76325410] }
 0x4cb   :  { %v1826_v1 = vshrl.u32 %v2392_v63, 16  ;;  %v1829_v2 = vshll.u32 %v2392_v63, 16  ;;  %v1816_v5 = vcombine.high %v2392_v63, %v2392_v63  ;;  %v2426_v39 = vld.sshfl [vmem:[#allocation2] sm:$0x12 pattern:$0x76325410] }
 0x4cc   :  { %v2393_v4 = vld.sshfl [vmem:[#allocation2 + $0x4] sm:$0x13 pattern:$0x76325410]  ;;  %v2077_v42 = vcombine.high %v2426_v39, %v2426_v39  ;;  %v2428_v47 = vrot.slane %v2426_v39, 9 }
 0x4cd   :  { %v1824_v7 = vcombine.high %v2393_v4, %v2393_v4  ;;  %v1828_v8 = vrot.slane %v1826_v1, 6  ;;  %v1831_v6 = vrot.slane %v1829_v2, 7  ;;  %v1840_v9 = vshrl.u32 %v2393_v4, 16 }
 0x4ce   :  { %v1843_v10 = vshll.u32 %v2393_v4, 16  ;;  %v1835_v12 = vshll.u32 %v1816_v5, 16  ;;  %v2996_v32 = vld.sshfl [vmem:[#allocation2] sm:$0xf pattern:$0x76325410] }
 0x4cf   :  { %v1832_v11 = vor.u32 %v1831_v6, %v1828_v8  ;;  %v1842_v13 = vrot.slane %v1840_v9, 6  ;;  %v1849_v15 = vshll.u32 %v1824_v7, 16  ;;  %v2427_v37 = vld.sshfl [vmem:[#allocation2 + $0x4] sm:$0x12 pattern:$0x76325410] }
 0x4d0   :  { %v1845_v14 = vrot.slane %v1843_v10, 7  ;;  %v1837_v56 = vrot.slane %v1835_v12, 7  ;;  %v2085_v40 = vcombine.high %v2427_v37, %v2427_v37  ;;  %v2088_v45 = vrot.slane %v2077_v42, 7 }
 0x4d1   :  { %v1833_v16 = vrot.slane %v1832_v11, 2  ;;  %v1851_v19 = vrot.slane %v1849_v15, 7  ;;  %v2429_v46 = vrot.slane %v2427_v37, 9 }
 0x4d2   :  { %v1846_v17 = vor.u32 %v1845_v14, %v1842_v13  ;;  %v2092_v43 = vrot.slane %v2085_v40, 7  ;;  %v2089_v50 = vsel %vm3528_vm7, %v2428_v47, %v2088_v45 }
 0x4d3   :  { %v1838_v20 = vsel %vm3437_vm15, %v1833_v16, %v1837_v56 }
 0x4d4   :  { %v1847_v18 = vrot.slane %v1846_v17, 2  ;;  %v2093_v48 = vsel %vm3528_vm7, %v2429_v46, %v2092_v43 }
 0x4d5   :  { %v2111_v51 = vcombine.low %v2089_v50, %v2093_v48 }
 0x4d6   :  { %v1852_v21 = vsel %vm3437_vm15, %v1847_v18, %v1851_v19 }
 0x4d7   :  { %v1870_v22 = vcombine.low %v1838_v20, %v1852_v21  ;;  %v2118_v52 = vrot.slane %v2111_v51, %v3450_v3 }
 0x4d9   :  { %v1877_v24 = vrot.slane %v1870_v22, %v3450_v3 }
 0x4db   :  { %2800 = vmatmul.mubr.bf16.vlgmr.msra.gmra.mrb[8].mxu0 %v1877_v24 }
 0x4dc   :  { %2804 = vmatpush3.bf16.msra.mxu0 %v2976_v23  ;;  %2819 = vmatprep.mubr.msk.bf16.mxu0 %vm3194_vm0, %v3193_v0 }
 0x4dd   :  { %2805 = vmatprep.subr.bf16.mxu0 %v3193_v0 }
 0x4e0   :  { %2806 = vmatpush3.bf16.msra.mxu0 %v2977_v25 }
 0x4e1   :  { %2807 = vmatprep.subr.bf16.mxu0 %v3193_v0 }
 0x4e4   :  { %2808 = vmatpush3.bf16.msra.mxu0 %v2978_v61 }
 0x4e5   :  { %2809 = vmatprep.subr.bf16.mxu0 %v3193_v0 }
 0x4e8   :  { %2810 = vmatpush3.bf16.msra.mxu0 %v2979_v26 }
 0x4e9   :  { %2811 = vmatprep.subr.bf16.mxu0 %v3193_v0 }
 0x4ec   :  { %2812 = vmatpush3.bf16.msra.mxu0 %v2980_v27 }
 0x4ed   :  { %2813 = vmatprep.subr.bf16.mxu0 %v3193_v0 }
 0x4f0   :  { %2814 = vmatpush3.bf16.msra.mxu0 %v2981_v28 }
 0x4f1   :  { %2815 = vmatprep.subr.bf16.mxu0 %v3193_v0 }
 0x4f4   :  { %2816 = vmatpush3.bf16.msra.mxu0 %v2982_v29 }
 0x4f5   :  { %2817 = vmatprep.subr.bf16.mxu0 %v3193_v0 }
 0x4f8   :  { %2818 = vmatpush3.bf16.msra.mxu0 %v2983_v31 }
 0x4f9   :  { %2823 = vmatprep.subr.bf16.mxu0 %v3193_v0 }
 0x4fb   :  { %2820 = vmatmul.mubr.bf16.vlgmr.msra.gmra.mrb[12].mxu0 %v2996_v32 }
 0x4fc   :  { %2824 = vmatpush3.bf16.msra.mxu0 %v2985_v33  ;;  %2839 = vmatprep.mubr.msk.bf16.mxu0 %vm3194_vm0, %v3193_v0 }
 0x4fd   :  { %2825 = vmatprep.subr.bf16.mxu0 %v3193_v0 }
 0x500   :  { %2826 = vmatpush3.bf16.msra.mxu0 %v2986_v34 }
 0x501   :  { %2827 = vmatprep.subr.bf16.mxu0 %v3193_v0 }
 0x504   :  { %2828 = vmatpush3.bf16.msra.mxu0 %v2987_v35 }
 0x505   :  { %2829 = vmatprep.subr.bf16.mxu0 %v3193_v0 }
 0x508   :  { %2830 = vmatpush3.bf16.msra.mxu0 %v2988_v36 }
 0x509   :  { %2831 = vmatprep.subr.bf16.mxu0 %v3193_v0 }
 0x50c   :  { %2832 = vmatpush3.bf16.msra.mxu0 %v2989_v38 }
 0x50d   :  { %2833 = vmatprep.subr.bf16.mxu0 %v3193_v0 }
 0x510   :  { %2834 = vmatpush3.bf16.msra.mxu0 %v2990_v41 }
 0x511   :  { %2835 = vmatprep.subr.bf16.mxu0 %v3193_v0 }
 0x514   :  { %2836 = vmatpush3.bf16.msra.mxu0 %v2991_v44 }
 0x515   :  { %2837 = vmatprep.subr.bf16.mxu0 %v3193_v0 }
 0x518   :  { %2838 = vmatpush3.bf16.msra.mxu0 %v2992_v49 }
 0x51b   :  { %2840 = vmatmul.mubr.bf16.vlgmr.msra.gmra.mrb[16].mxu0 %v2118_v52 }
 0x51c   :  { %3140 = shalt.err (!%p3137_p10)
}
 0x51d   :  { %s3141_s5 = scalar_lea.hbm %s3797_s14, 64 }
 0x51e   :  { %p3142_p11 = scmp.ne.s32.totalorder %s3797_s14, %s3141_s5  ;;  %p3145_p12 = scmp.lt.u32.totalorder %s3141_s5, %s3797_s14 }
 0x520   :  { %p3147_p13 = pnand %p3145_p12, %p3142_p11 }
 0x522   :  { %3150 = shalt.err (!%p3147_p13)
}
 0x523   :  { %2228 = dma.vmem_to_hbm [thread:$0]  %s2226_s21, 64, %s3797_s14, [#allocation5]   ;;  %v2454_v62 = vld [vmem:[%s3796_s13] ss:$0 sm:$0xff]  ;;  %vm2217_vm0 = vcmask 130048  }
 0x524   :  { %s3198_s28 = smov [#allocation15]  }
 0x525   :  { %s2235_s26 = sshll.u32 %s3198_s28, 4  ;;  %s2236_s26 = int_to_ptr.vmem [resolvable:$true] %s2235_s26 }
 0x526   :  { %s3151_s14 = scalar_lea.vmem %s2236_s26, 128  ;;  %p3156_p1 = scmp.lt.s32.totalorder %s2236_s26, %s2236_s26 }
 0x527   :  { %p3152_p0 = scmp.ne.s32.totalorder %s2236_s26, %s3151_s14  ;;  %p3157_p2 = scmp.lt.s32.totalorder %s3151_s14, %s3151_s14 }
 0x529   :  { %p3158_p3 = por %p3157_p2, %p3156_p1 }
 0x52b   :  { %p3159_p4 = pnand %p3158_p3, %p3152_p0 }
 0x5ae   :  { %v1961_v0 = vpop.f32.mrb[8].mxu0 }
 0x5af   :  { %v2801_v3 = vpop.f32.mrb[9].mxu0 }
 0x5b0   :  { %v1964_v30 = vpop.f32.mrb[10].mxu0 }
 0x5b1   :  { %v2802_v53 = vpop.f32.mrb[11].mxu0 }
 0x5ce   :  { %v2060_v54 = vpop.f32.mrb[12].mxu0 }
 0x5cf   :  { %v2061_v55 = vadd.f32 %v2060_v54, %v1961_v0  ;;  %v2821_v57 = vpop.f32.mrb[13].mxu0 }
 0x5d0   :  { %v2063_v58 = vpop.f32.mrb[14].mxu0 }
 0x5d1   :  { %v2822_v59 = vpop.f32.mrb[15].mxu0 }
 0x5ee   :  { %v2202_v60 = vpop.f32.mrb[16].mxu0 }
 0x5ef   :  { %v2208_v63 = vadd.f32 %v2202_v60, %v2061_v55  ;;  %v2841_v1 = vpop.f32.mrb[17].mxu0 }
 0x5f0   :  { %v2205_v2 = vpop.f32.mrb[18].mxu0 }
 0x5f1   :  { %v2216_v4 = vadd.f32 %v2454_v62, %v2208_v63  ;;  %v2842_v5 = vpop.f32.mrb[19].mxu0 }
 0x5f3   :  { %2218 = vst.msk [vmem:[#allocation15] sm:$0xff] %vm2217_vm0, %v2216_v4 }
 0x5f4   :  { %3162 = shalt.err (!%p3159_p4)
}
 0x5f5   :  { %s3163_s13 = scalar_lea.hbm %s3798_s15, 128 }
 0x5f6   :  { %p3164_p5 = scmp.ne.s32.totalorder %s3798_s15, %s3163_s13  ;;  %p3167_p6 = scmp.lt.u32.totalorder %s3163_s13, %s3798_s15 }
 0x5f8   :  { %p3169_p7 = pnand %p3167_p6, %p3164_p5 }
 0x5fa   :  { %3172 = shalt.err (!%p3169_p7)
}
 0x5fb   :  { %2238 = dma.vmem_to_hbm [thread:$0]  %s2236_s26, 128, %s3798_s15, [#allocation16]  }
 0x5fc   :  { %3181 = dma.done.wait [#allocation5], 64  }
 0x5fd   :  { %3182 = vsyncadd [#allocation5], 4294967232 }
 0x5fe   :  { %3183 = dma.done.wait [#allocation16], 128  }
 0x5ff   :  { %3184 = vsyncadd [#allocation16], 4294967168 }
 0x600   :  { %2245 = vsyncpa [#allocation4], 1 }
 0x601   :  { %2246 = vsyncpa [#allocation7], 1 }
 0x602   :  { %2247 = vsyncpa [#allocation10], 1 }
 0x603   :  { %2248 = vsyncpa [#allocation13], 1 }
 0x604   :  { %2249 = vsyncpa [#allocation5], 1 }
 0x605   :  { %2250 = vsyncpa [#allocation16], 1 }

</bundles_post_ra>
